<compile_context>
chip_gen: v7x
topology: tpu7x:2x2x1
jax: 0.10.0
libtpu: 0.0.40
codegen_flags: <defaults>
</compile_context>

<pallas_src>
import jax
import jax.numpy as jnp
from jax.experimental import pallas as pl
from jax.experimental.pallas import tpu as pltpu

N_LAYERS = 2
BN_EPS = 1e-5           # PyTorch BatchNorm1d default
LANES = 128             # TPU lane width


def _round_up(n, m):
    return ((n + m - 1) // m) * m


def _pad_to(a, shape):
    return jnp.pad(a, [(0, t - s) for s, t in zip(a.shape, shape)])


def graphconv_kernel(x_ref, adj_ref, dinv_ref, w0_ref, b0_ref,
                     sc_ref, sh_ref, wc_ref, bc_ref, out_ref,
                     x0_buf, h_buf, hs_buf):
    l = pl.program_id(0)          # 0 = input projection, 1..L = graph-conv layers
    i = pl.program_id(1)          # row tile
    tm, hp = out_ref.shape
    n_layers = bc_ref.shape[0]
    row0 = pl.multiple_of(i * tm, tm)

    @pl.when(l == 0)
    def _input_projection():
        # fcs[0] + BN0 (folded) + ReLU    (dropout = identity in eval mode)
        h = jnp.dot(x_ref[...], w0_ref[...], preferred_element_type=jnp.float32)
        h = h + b0_ref[...]
        h = h * sc_ref[pl.ds(0, 1), :] + sh_ref[pl.ds(0, 1), :]
        h = jnp.maximum(h, 0.0)
        x0_buf[pl.ds(row0, tm), :] = h      # layer_[0]  (residual source)
        h_buf[pl.ds(row0, tm), :] = h
        out_ref[...] = h

    def conv_layer(lc):           # lc: static layer index (1-based)
        # Hoisted once per layer (first row tile): pre-scale the previous
        # activations by D^{-1/2}; every row tile then only needs
        #   dinv_rows * (A_tile @ hs)    -- no per-matmul rescaling of h.
        @pl.when(i == 0)
        def _():
            hs_buf[...] = dinv_ref[...] * h_buf[...]

        a = adj_ref[...].astype(jnp.float32)                     # bf16 0/1 -> f32 (exact)
        t = jnp.dot(a, hs_buf[...], preferred_element_type=jnp.float32)
        t = dinv_ref[pl.ds(row0, tm), :] * t                     # left D^{-1/2}
        w = wc_ref[pl.ds((lc - 1) * hp, hp), :]                  # conv.W (static slice)
        h = jnp.dot(t, w, preferred_element_type=jnp.float32)
        h = h + bc_ref[pl.ds(lc - 1, 1), :]
        h = h * sc_ref[pl.ds(lc, 1), :] + sh_ref[pl.ds(lc, 1), :]  # BN (folded, eval)
        h = jnp.maximum(h, 0.0)                                  # use_act
        h = h + x0_buf[pl.ds(row0, tm), :]                       # use_residual
        h_buf[pl.ds(row0, tm), :] = h
        out_ref[...] = h

    # num_layers is small & static -> unroll with pl.when so every parameter
    # access is a static slice (no dynamic sublane indexing).
    for lc in range(1, n_layers + 1):
        pl.when(l == lc)(lambda lc=lc: conv_layer(lc))


def graphconv_forward(x, adj, params, *, tm=None):
    """x: [N, C_in] f32; adj: dense [N, N] 0/1 (bf16 preferred); params: dict."""
    N, c_in = x.shape
    H = params["w0"].shape[1]
    L = params["wc"].shape[0]
    CP = _round_up(c_in, LANES)
    HP = _round_up(H, LANES)
    if tm is None:
        tm = N if N <= 256 else 256      # row-tile: VMEM knob (adj tile = tm x N)
    assert N % tm == 0, "N must be divisible by the row-tile size"

    f32 = jnp.float32
    # ---- lane-dense padding of all feature dimensions (to 128 lanes) ----
    x_p = _pad_to(x.astype(f32), (N, CP))
    w0_p = _pad_to(params["w0"].astype(f32), (CP, HP))
    b0_p = _pad_to(params["b0"].astype(f32)[None, :], (1, HP))
    # ---- fold eval-mode BatchNorm into (scale, shift); padded lanes -> exact 0 ----
    scale = params["bn_g"] * jax.lax.rsqrt(params["bn_v"] + BN_EPS)
    shift = params["bn_b"] - params["bn_m"] * scale
    sc_p = _pad_to(scale.astype(f32), (L + 1, HP))
    sh_p = _pad_to(shift.astype(f32), (L + 1, HP))
    wc_p = jnp.pad(params["wc"].astype(f32),
                   ((0, 0), (0, HP - H), (0, HP - H))).reshape(L * HP, HP)
    bc_p = _pad_to(params["bc"].astype(f32), (L, HP))
    # ---- normalize_adj, hoisted: degree / D^{-1/2} computed once (adj reused by all layers) ----
    d = jnp.sum(adj.astype(f32), axis=1, keepdims=True)
    dinv = jnp.where(d > 0.0, jax.lax.rsqrt(d), 0.0)       # nan_to_num semantics

    grid = (L + 1, N // tm)

    def full(shape):
        nd = len(shape)
        return pl.BlockSpec(shape, lambda l, i, _nd=nd: (0,) * _nd)

    out = pl.pallas_call(
        graphconv_kernel,
        out_shape=jax.ShapeDtypeStruct((N, HP), f32),
        grid_spec=pltpu.PrefetchScalarGridSpec(
            num_scalar_prefetch=0,
            grid=grid,
            in_specs=[
                pl.BlockSpec((tm, CP), lambda l, i: (i, 0)),   # x row tile
                pl.BlockSpec((tm, N), lambda l, i: (i, 0)),    # adj row tile (bf16)
                full((N, 1)),                                  # D^{-1/2}
                full((CP, HP)), full((1, HP)),                 # W0, b0
                full((L + 1, HP)), full((L + 1, HP)),          # BN scale, shift (folded)
                full((L * HP, HP)), full((L, HP)),             # Wc (stacked), bc
            ],
            out_specs=pl.BlockSpec((tm, HP), lambda l, i: (i, 0)),
            scratch_shapes=[
                pltpu.VMEM((N, HP), f32),    # x0     (layer_[0], residual source)
                pltpu.VMEM((N, HP), f32),    # h      (current layer activations)
                pltpu.VMEM((N, HP), f32),    # D^{-1/2} h_prev (shared across row tiles)
            ],
        ),
        compiler_params=pltpu.CompilerParams(
            # Both axes carry a sequential dependency through the VMEM-resident
            # activations -> "arbitrary".  Batch many graphs along a leading
            # "parallel" axis if megacore sharding is wanted at these toy sizes.
            dimension_semantics=("arbitrary", "arbitrary"),
            vmem_limit_bytes=32 * 1024 * 1024,
        ),
    )(x_p, adj, dinv, w0_p, b0_p, sc_p, sh_p, wc_p, bc_p)
    return out[:, :H]


def ref_forward(x, adj, p):
    """Pure-JAX reference mirroring the PyTorch forward (eval mode)."""
    d = adj.sum(axis=1)
    dinv = jnp.where(d > 0, 1.0 / jnp.sqrt(d), 0.0)
    adj_n = dinv[:, None] * adj * dinv[None, :]
    adj_n = jnp.nan_to_num(adj_n, nan=0.0, posinf=0.0, neginf=0.0)

    def bn(h, l):
        return (h - p["bn_m"][l]) * p["bn_g"][l] / jnp.sqrt(p["bn_v"][l] + BN_EPS) + p["bn_b"][l]

    h = jnp.maximum(bn(x @ p["w0"] + p["b0"], 0), 0.0)
    x0 = h
    for l in range(N_LAYERS):
        h = adj_n @ h
        h = h @ p["wc"][l] + p["bc"][l]
        h = jnp.maximum(bn(h, l + 1), 0.0) + x0
    return h


if __name__ == "__main__":
    key = jax.random.PRNGKey(0)
    N, C_IN, H = 64, 16, 32
    ks = jax.random.split(key, 10)

    x = jax.random.normal(ks[0], (N, C_IN), jnp.float32)

    # dense 0/1 adjacency with self-loops (every row degree > 0); stored bf16
    # (exact for 0/1) so the kernel streams the N^2 operand at half the bytes.
    adj_f32 = (jax.random.uniform(ks[1], (N, N)) < 0.15).astype(jnp.float32)
    adj_f32 = jnp.minimum(jnp.maximum(adj_f32, adj_f32.T) + jnp.eye(N, dtype=jnp.float32), 1.0)
    adj = adj_f32.astype(jnp.bfloat16)

    params = dict(
        w0=0.1 * jax.random.normal(ks[2], (C_IN, H), jnp.float32),
        b0=0.01 * jax.random.normal(ks[3], (H,), jnp.float32),
        bn_g=1.0 + 0.1 * jax.random.normal(ks[4], (N_LAYERS + 1, H), jnp.float32),
        bn_b=0.05 * jax.random.normal(ks[5], (N_LAYERS + 1, H), jnp.float32),
        bn_m=0.02 * jax.random.normal(ks[6], (N_LAYERS + 1, H), jnp.float32),
        bn_v=jnp.abs(1.0 + 0.1 * jax.random.normal(ks[7], (N_LAYERS + 1, H), jnp.float32)),
        wc=0.1 * jax.random.normal(ks[8], (N_LAYERS, H, H), jnp.float32),
        bc=0.01 * jax.random.normal(ks[9], (N_LAYERS, H), jnp.float32),
    )

    out = graphconv_forward(x, adj, params)
    jax.block_until_ready(out)

    r = ref_forward(x, adj_f32, params)
    assert out.shape == (N, H) and out.dtype == jnp.float32
    err = float(jnp.abs(out - r).max())
    assert jnp.allclose(out, r, atol=1e-4, rtol=1e-4), err
    # TODO(synk): training-mode dropout (random masking) is intentionally not
    # reproduced; kernel implements the deterministic eval-mode forward.
    print("KERNEL_OK")
</pallas_src>

<mosaic_0001>
module attributes {stable_mosaic.version = 11 : i64} {
  func.func @graphconv_kernel(%arg0: i32, %arg1: i32, %arg2: memref<64x128xf32, #tpu.memory_space<vmem>>, %arg3: memref<64x64xbf16, #tpu.memory_space<vmem>>, %arg4: memref<64x1xf32, #tpu.memory_space<vmem>>, %arg5: memref<128x128xf32, #tpu.memory_space<vmem>>, %arg6: memref<1x128xf32, #tpu.memory_space<vmem>>, %arg7: memref<3x128xf32, #tpu.memory_space<vmem>>, %arg8: memref<3x128xf32, #tpu.memory_space<vmem>>, %arg9: memref<256x128xf32, #tpu.memory_space<vmem>>, %arg10: memref<2x128xf32, #tpu.memory_space<vmem>>, %arg11: memref<64x128xf32, #tpu.memory_space<vmem>>, %arg12: memref<64x128xf32, #tpu.memory_space<vmem>>, %arg13: memref<64x128xf32, #tpu.memory_space<vmem>>, %arg14: memref<64x128xf32, #tpu.memory_space<vmem>>) attributes {dimension_semantics = [#tpu.dimension_semantics<arbitrary>, #tpu.dimension_semantics<arbitrary>], iteration_bounds = array<i64: 3, 1>, scalar_prefetch = 0 : i64, scratch_operands = 3 : i64, tpu.core_type = #tpu.core_type<tc>, window_params = [{transform_indices = @transform_0, window_bounds = array<i64: 64, 128>}, {transform_indices = @transform_1, window_bounds = array<i64: 64, 64>}, {pipeline_mode = #tpu.pipeline_mode<synchronous>, transform_indices = @transform_2, window_bounds = array<i64: 64, 1>}, {pipeline_mode = #tpu.pipeline_mode<synchronous>, transform_indices = @transform_3, window_bounds = array<i64: 128, 128>}, {pipeline_mode = #tpu.pipeline_mode<synchronous>, transform_indices = @transform_4, window_bounds = array<i64: 1, 128>}, {pipeline_mode = #tpu.pipeline_mode<synchronous>, transform_indices = @transform_5, window_bounds = array<i64: 3, 128>}, {pipeline_mode = #tpu.pipeline_mode<synchronous>, transform_indices = @transform_6, window_bounds = array<i64: 3, 128>}, {pipeline_mode = #tpu.pipeline_mode<synchronous>, transform_indices = @transform_7, window_bounds = array<i64: 256, 128>}, {pipeline_mode = #tpu.pipeline_mode<synchronous>, transform_indices = @transform_8, window_bounds = array<i64: 2, 128>}, {transform_indices = @transform_9, window_bounds = array<i64: 64, 128>}]} {
    %c64_i32 = arith.constant 64 : i32
    %0 = arith.muli %arg1, %c64_i32 : i32
    %1 = tpu.assume_multiple %0, 64 : i32
    %c0_i32 = arith.constant 0 : i32
    %2 = arith.cmpi eq, %arg0, %c0_i32 : i32
    %3 = arith.extui %2 : i1 to i32
    %c0_i32_0 = arith.constant 0 : i32
    %4 = arith.cmpi ne, %3, %c0_i32_0 : i32
    scf.if %4 {
      %c0 = arith.constant 0 : index
      %c0_3 = arith.constant 0 : index
      %11 = vector.load %arg2[%c0, %c0_3] : memref<64x128xf32, #tpu.memory_space<vmem>>, vector<64x128xf32>
      %c0_4 = arith.constant 0 : index
      %c0_5 = arith.constant 0 : index
      %12 = vector.load %arg5[%c0_4, %c0_5] : memref<128x128xf32, #tpu.memory_space<vmem>>, vector<128x128xf32>
      %cst = arith.constant dense<0.000000e+00> : vector<64x128xf32>
      %13 = tpu.matmul %11, %12, %cst {dimension_numbers = #tpu.dot_dimension_numbers<[1], [0], [0], [1], [0, 0, 1, 1], [], []>} : vector<64x128xf32>, vector<128x128xf32>, vector<64x128xf32> -> vector<64x128xf32>
      %c0_6 = arith.constant 0 : index
      %c0_7 = arith.constant 0 : index
      %14 = vector.load %arg6[%c0_6, %c0_7] : memref<1x128xf32, #tpu.memory_space<vmem>>, vector<1x128xf32>
      %15 = vector.broadcast %14 : vector<1x128xf32> to vector<64x128xf32>
      %16 = arith.addf %13, %15 : vector<64x128xf32>
      %c0_8 = arith.constant 0 : index
      %c0_9 = arith.constant 0 : index
      %17 = vector.load %arg7[%c0_8, %c0_9] : memref<3x128xf32, #tpu.memory_space<vmem>>, vector<1x128xf32>
      %18 = vector.broadcast %17 : vector<1x128xf32> to vector<64x128xf32>
      %19 = arith.mulf %16, %18 : vector<64x128xf32>
      %c0_10 = arith.constant 0 : index
      %c0_11 = arith.constant 0 : index
      %20 = vector.load %arg8[%c0_10, %c0_11] : memref<3x128xf32, #tpu.memory_space<vmem>>, vector<1x128xf32>
      %21 = vector.broadcast %20 : vector<1x128xf32> to vector<64x128xf32>
      %22 = arith.addf %19, %21 : vector<64x128xf32>
      %cst_12 = arith.constant 0.000000e+00 : f32
      %23 = vector.broadcast %cst_12 : f32 to vector<64x128xf32>
      %24 = arith.maximumf %22, %23 : vector<64x128xf32>
      %25 = arith.index_cast %1 : i32 to index
      %c0_13 = arith.constant 0 : index
      %26 = vector.load %arg12[%25, %c0_13] : memref<64x128xf32, #tpu.memory_space<vmem>>, vector<64x128xf32>
      tpu.vector_store %arg12[%25, %c0_13], %24 {strides = array<i32>} : memref<64x128xf32, #tpu.memory_space<vmem>>, vector<64x128xf32>,
      %27 = arith.index_cast %1 : i32 to index
      %c0_14 = arith.constant 0 : index
      %28 = vector.load %arg13[%27, %c0_14] : memref<64x128xf32, #tpu.memory_space<vmem>>, vector<64x128xf32>
      tpu.vector_store %arg13[%27, %c0_14], %24 {strides = array<i32>} : memref<64x128xf32, #tpu.memory_space<vmem>>, vector<64x128xf32>,
      %c0_15 = arith.constant 0 : index
      %c0_16 = arith.constant 0 : index
      %29 = vector.load %arg11[%c0_15, %c0_16] : memref<64x128xf32, #tpu.memory_space<vmem>>, vector<64x128xf32>
      tpu.vector_store %arg11[%c0_15, %c0_16], %24 {strides = array<i32>} : memref<64x128xf32, #tpu.memory_space<vmem>>, vector<64x128xf32>,
    } else {
    }
    %c1_i32 = arith.constant 1 : i32
    %5 = arith.cmpi eq, %arg0, %c1_i32 : i32
    %6 = arith.extui %5 : i1 to i32
    %c0_i32_1 = arith.constant 0 : i32
    %7 = arith.cmpi ne, %6, %c0_i32_1 : i32
    scf.if %7 {
      %c0_i32_3 = arith.constant 0 : i32
      %11 = arith.cmpi eq, %arg1, %c0_i32_3 : i32
      %12 = arith.extui %11 : i1 to i32
      %c0_i32_4 = arith.constant 0 : i32
      %13 = arith.cmpi ne, %12, %c0_i32_4 : i32
      scf.if %13 {
        %c0_22 = arith.constant 0 : index
        %c0_23 = arith.constant 0 : index
        %41 = vector.load %arg4[%c0_22, %c0_23] : memref<64x1xf32, #tpu.memory_space<vmem>>, vector<64x1xf32>
        %c0_24 = arith.constant 0 : index
        %c0_25 = arith.constant 0 : index
        %42 = vector.load %arg13[%c0_24, %c0_25] : memref<64x128xf32, #tpu.memory_space<vmem>>, vector<64x128xf32>
        %43 = vector.broadcast %41 : vector<64x1xf32> to vector<64x128xf32>
        %44 = arith.mulf %43, %42 : vector<64x128xf32>
        %c0_26 = arith.constant 0 : index
        %c0_27 = arith.constant 0 : index
        %45 = vector.load %arg14[%c0_26, %c0_27] : memref<64x128xf32, #tpu.memory_space<vmem>>, vector<64x128xf32>
        tpu.vector_store %arg14[%c0_26, %c0_27], %44 {strides = array<i32>} : memref<64x128xf32, #tpu.memory_space<vmem>>, vector<64x128xf32>,
      } else {
      }
      %c0 = arith.constant 0 : index
      %c0_5 = arith.constant 0 : index
      %14 = vector.load %arg3[%c0, %c0_5] : memref<64x64xbf16, #tpu.memory_space<vmem>>, vector<64x64xbf16>
      %15 = arith.extf %14 : vector<64x64xbf16> to vector<64x64xf32>
      %c0_6 = arith.constant 0 : index
      %c0_7 = arith.constant 0 : index
      %16 = vector.load %arg14[%c0_6, %c0_7] : memref<64x128xf32, #tpu.memory_space<vmem>>, vector<64x128xf32>
      %cst = arith.constant dense<0.000000e+00> : vector<64x128xf32>
      %17 = tpu.matmul %15, %16, %cst {dimension_numbers = #tpu.dot_dimension_numbers<[1], [0], [0], [1], [0, 0, 1, 1], [], []>} : vector<64x64xf32>, vector<64x128xf32>, vector<64x128xf32> -> vector<64x128xf32>
      %18 = arith.index_cast %1 : i32 to index
      %c0_8 = arith.constant 0 : index
      %19 = vector.load %arg4[%18, %c0_8] : memref<64x1xf32, #tpu.memory_space<vmem>>, vector<64x1xf32>
      %20 = vector.broadcast %19 : vector<64x1xf32> to vector<64x128xf32>
      %21 = arith.mulf %20, %17 : vector<64x128xf32>
      %c0_9 = arith.constant 0 : index
      %c0_10 = arith.constant 0 : index
      %22 = vector.load %arg9[%c0_9, %c0_10] : memref<256x128xf32, #tpu.memory_space<vmem>>, vector<128x128xf32>
      %cst_11 = arith.constant dense<0.000000e+00> : vector<64x128xf32>
      %23 = tpu.matmul %21, %22, %cst_11 {dimension_numbers = #tpu.dot_dimension_numbers<[1], [0], [0], [1], [0, 0, 1, 1], [], []>} : vector<64x128xf32>, vector<128x128xf32>, vector<64x128xf32> -> vector<64x128xf32>
      %c0_12 = arith.constant 0 : index
      %c0_13 = arith.constant 0 : index
      %24 = vector.load %arg10[%c0_12, %c0_13] : memref<2x128xf32, #tpu.memory_space<vmem>>, vector<1x128xf32>
      %25 = vector.broadcast %24 : vector<1x128xf32> to vector<64x128xf32>
      %26 = arith.addf %23, %25 : vector<64x128xf32>
      %c1 = arith.constant 1 : index
      %c0_14 = arith.constant 0 : index
      %27 = vector.load %arg7[%c1, %c0_14] : memref<3x128xf32, #tpu.memory_space<vmem>>, vector<1x128xf32>
      %28 = vector.broadcast %27 : vector<1x128xf32> to vector<64x128xf32>
      %29 = arith.mulf %26, %28 : vector<64x128xf32>
      %c1_15 = arith.constant 1 : index
      %c0_16 = arith.constant 0 : index
      %30 = vector.load %arg8[%c1_15, %c0_16] : memref<3x128xf32, #tpu.memory_space<vmem>>, vector<1x128xf32>
      %31 = vector.broadcast %30 : vector<1x128xf32> to vector<64x128xf32>
      %32 = arith.addf %29, %31 : vector<64x128xf32>
      %cst_17 = arith.constant 0.000000e+00 : f32
      %33 = vector.broadcast %cst_17 : f32 to vector<64x128xf32>
      %34 = arith.maximumf %32, %33 : vector<64x128xf32>
      %35 = arith.index_cast %1 : i32 to index
      %c0_18 = arith.constant 0 : index
      %36 = vector.load %arg12[%35, %c0_18] : memref<64x128xf32, #tpu.memory_space<vmem>>, vector<64x128xf32>
      %37 = arith.addf %34, %36 : vector<64x128xf32>
      %38 = arith.index_cast %1 : i32 to index
      %c0_19 = arith.constant 0 : index
      %39 = vector.load %arg13[%38, %c0_19] : memref<64x128xf32, #tpu.memory_space<vmem>>, vector<64x128xf32>
      tpu.vector_store %arg13[%38, %c0_19], %37 {strides = array<i32>} : memref<64x128xf32, #tpu.memory_space<vmem>>, vector<64x128xf32>,
      %c0_20 = arith.constant 0 : index
      %c0_21 = arith.constant 0 : index
      %40 = vector.load %arg11[%c0_20, %c0_21] : memref<64x128xf32, #tpu.memory_space<vmem>>, vector<64x128xf32>
      tpu.vector_store %arg11[%c0_20, %c0_21], %37 {strides = array<i32>} : memref<64x128xf32, #tpu.memory_space<vmem>>, vector<64x128xf32>,
    } else {
    }
    %c2_i32 = arith.constant 2 : i32
    %8 = arith.cmpi eq, %arg0, %c2_i32 : i32
    %9 = arith.extui %8 : i1 to i32
    %c0_i32_2 = arith.constant 0 : i32
    %10 = arith.cmpi ne, %9, %c0_i32_2 : i32
    scf.if %10 {
      %c0_i32_3 = arith.constant 0 : i32
      %11 = arith.cmpi eq, %arg1, %c0_i32_3 : i32
      %12 = arith.extui %11 : i1 to i32
      %c0_i32_4 = arith.constant 0 : i32
      %13 = arith.cmpi ne, %12, %c0_i32_4 : i32
      scf.if %13 {
        %c0_20 = arith.constant 0 : index
        %c0_21 = arith.constant 0 : index
        %41 = vector.load %arg4[%c0_20, %c0_21] : memref<64x1xf32, #tpu.memory_space<vmem>>, vector<64x1xf32>
        %c0_22 = arith.constant 0 : index
        %c0_23 = arith.constant 0 : index
        %42 = vector.load %arg13[%c0_22, %c0_23] : memref<64x128xf32, #tpu.memory_space<vmem>>, vector<64x128xf32>
        %43 = vector.broadcast %41 : vector<64x1xf32> to vector<64x128xf32>
        %44 = arith.mulf %43, %42 : vector<64x128xf32>
        %c0_24 = arith.constant 0 : index
        %c0_25 = arith.constant 0 : index
        %45 = vector.load %arg14[%c0_24, %c0_25] : memref<64x128xf32, #tpu.memory_space<vmem>>, vector<64x128xf32>
        tpu.vector_store %arg14[%c0_24, %c0_25], %44 {strides = array<i32>} : memref<64x128xf32, #tpu.memory_space<vmem>>, vector<64x128xf32>,
      } else {
      }
      %c0 = arith.constant 0 : index
      %c0_5 = arith.constant 0 : index
      %14 = vector.load %arg3[%c0, %c0_5] : memref<64x64xbf16, #tpu.memory_space<vmem>>, vector<64x64xbf16>
      %15 = arith.extf %14 : vector<64x64xbf16> to vector<64x64xf32>
      %c0_6 = arith.constant 0 : index
      %c0_7 = arith.constant 0 : index
      %16 = vector.load %arg14[%c0_6, %c0_7] : memref<64x128xf32, #tpu.memory_space<vmem>>, vector<64x128xf32>
      %cst = arith.constant dense<0.000000e+00> : vector<64x128xf32>
      %17 = tpu.matmul %15, %16, %cst {dimension_numbers = #tpu.dot_dimension_numbers<[1], [0], [0], [1], [0, 0, 1, 1], [], []>} : vector<64x64xf32>, vector<64x128xf32>, vector<64x128xf32> -> vector<64x128xf32>
      %18 = arith.index_cast %1 : i32 to index
      %c0_8 = arith.constant 0 : index
      %19 = vector.load %arg4[%18, %c0_8] : memref<64x1xf32, #tpu.memory_space<vmem>>, vector<64x1xf32>
      %20 = vector.broadcast %19 : vector<64x1xf32> to vector<64x128xf32>
      %21 = arith.mulf %20, %17 : vector<64x128xf32>
      %c128 = arith.constant 128 : index
      %c0_9 = arith.constant 0 : index
      %22 = vector.load %arg9[%c128, %c0_9] : memref<256x128xf32, #tpu.memory_space<vmem>>, vector<128x128xf32>
      %cst_10 = arith.constant dense<0.000000e+00> : vector<64x128xf32>
      %23 = tpu.matmul %21, %22, %cst_10 {dimension_numbers = #tpu.dot_dimension_numbers<[1], [0], [0], [1], [0, 0, 1, 1], [], []>} : vector<64x128xf32>, vector<128x128xf32>, vector<64x128xf32> -> vector<64x128xf32>
      %c1 = arith.constant 1 : index
      %c0_11 = arith.constant 0 : index
      %24 = vector.load %arg10[%c1, %c0_11] : memref<2x128xf32, #tpu.memory_space<vmem>>, vector<1x128xf32>
      %25 = vector.broadcast %24 : vector<1x128xf32> to vector<64x128xf32>
      %26 = arith.addf %23, %25 : vector<64x128xf32>
      %c2 = arith.constant 2 : index
      %c0_12 = arith.constant 0 : index
      %27 = vector.load %arg7[%c2, %c0_12] : memref<3x128xf32, #tpu.memory_space<vmem>>, vector<1x128xf32>
      %28 = vector.broadcast %27 : vector<1x128xf32> to vector<64x128xf32>
      %29 = arith.mulf %26, %28 : vector<64x128xf32>
      %c2_13 = arith.constant 2 : index
      %c0_14 = arith.constant 0 : index
      %30 = vector.load %arg8[%c2_13, %c0_14] : memref<3x128xf32, #tpu.memory_space<vmem>>, vector<1x128xf32>
      %31 = vector.broadcast %30 : vector<1x128xf32> to vector<64x128xf32>
      %32 = arith.addf %29, %31 : vector<64x128xf32>
      %cst_15 = arith.constant 0.000000e+00 : f32
      %33 = vector.broadcast %cst_15 : f32 to vector<64x128xf32>
      %34 = arith.maximumf %32, %33 : vector<64x128xf32>
      %35 = arith.index_cast %1 : i32 to index
      %c0_16 = arith.constant 0 : index
      %36 = vector.load %arg12[%35, %c0_16] : memref<64x128xf32, #tpu.memory_space<vmem>>, vector<64x128xf32>
      %37 = arith.addf %34, %36 : vector<64x128xf32>
      %38 = arith.index_cast %1 : i32 to index
      %c0_17 = arith.constant 0 : index
      %39 = vector.load %arg13[%38, %c0_17] : memref<64x128xf32, #tpu.memory_space<vmem>>, vector<64x128xf32>
      tpu.vector_store %arg13[%38, %c0_17], %37 {strides = array<i32>} : memref<64x128xf32, #tpu.memory_space<vmem>>, vector<64x128xf32>,
      %c0_18 = arith.constant 0 : index
      %c0_19 = arith.constant 0 : index
      %40 = vector.load %arg11[%c0_18, %c0_19] : memref<64x128xf32, #tpu.memory_space<vmem>>, vector<64x128xf32>
      tpu.vector_store %arg11[%c0_18, %c0_19], %37 {strides = array<i32>} : memref<64x128xf32, #tpu.memory_space<vmem>>, vector<64x128xf32>,
    } else {
    }
    return
  }
  func.func @transform_0(%arg0: i32, %arg1: i32) -> (i32, i32) {
    %c0_i32 = arith.constant 0 : i32
    %c0_i32_0 = arith.constant 0 : i32
    return %arg1, %c0_i32 : i32, i32
  }
  func.func @transform_1(%arg0: i32, %arg1: i32) -> (i32, i32) {
    %c0_i32 = arith.constant 0 : i32
    %c0_i32_0 = arith.constant 0 : i32
    return %arg1, %c0_i32 : i32, i32
  }
  func.func @transform_2(%arg0: i32, %arg1: i32) -> (i32, i32) {
    %c0_i32 = arith.constant 0 : i32
    %c0_i32_0 = arith.constant 0 : i32
    %c0_i32_1 = arith.constant 0 : i32
    return %c0_i32, %c0_i32_0 : i32, i32
  }
  func.func @transform_3(%arg0: i32, %arg1: i32) -> (i32, i32) {
    %c0_i32 = arith.constant 0 : i32
    %c0_i32_0 = arith.constant 0 : i32
    %c0_i32_1 = arith.constant 0 : i32
    return %c0_i32, %c0_i32_0 : i32, i32
  }
  func.func @transform_4(%arg0: i32, %arg1: i32) -> (i32, i32) {
    %c0_i32 = arith.constant 0 : i32
    %c0_i32_0 = arith.constant 0 : i32
    %c0_i32_1 = arith.constant 0 : i32
    return %c0_i32, %c0_i32_0 : i32, i32
  }
  func.func @transform_5(%arg0: i32, %arg1: i32) -> (i32, i32) {
    %c0_i32 = arith.constant 0 : i32
    %c0_i32_0 = arith.constant 0 : i32
    %c0_i32_1 = arith.constant 0 : i32
    return %c0_i32, %c0_i32_0 : i32, i32
  }
  func.func @transform_6(%arg0: i32, %arg1: i32) -> (i32, i32) {
    %c0_i32 = arith.constant 0 : i32
    %c0_i32_0 = arith.constant 0 : i32
    %c0_i32_1 = arith.constant 0 : i32
    return %c0_i32, %c0_i32_0 : i32, i32
  }
  func.func @transform_7(%arg0: i32, %arg1: i32) -> (i32, i32) {
    %c0_i32 = arith.constant 0 : i32
    %c0_i32_0 = arith.constant 0 : i32
    %c0_i32_1 = arith.constant 0 : i32
    return %c0_i32, %c0_i32_0 : i32, i32
  }
  func.func @transform_8(%arg0: i32, %arg1: i32) -> (i32, i32) {
    %c0_i32 = arith.constant 0 : i32
    %c0_i32_0 = arith.constant 0 : i32
    %c0_i32_1 = arith.constant 0 : i32
    return %c0_i32, %c0_i32_0 : i32, i32
  }
  func.func @transform_9(%arg0: i32, %arg1: i32) -> (i32, i32) {
    %c0_i32 = arith.constant 0 : i32
    %c0_i32_0 = arith.constant 0 : i32
    return %arg1, %c0_i32 : i32, i32
  }
}

</mosaic_0001>

<bundles_post_ra>
// kernel: tpu_custom_call.1
= control target key start
LH: loop header
LB: loop body
LE: loop exit
PB: predicated region body
PF: predicated region fallthrough
CT: control target
= control target key end

     0   :  { %14 = vsyncpa [#allocation6], 0  ;;  %s2766_s0 = inlined_call_operand.vmem [shape: f32[64,128], index: 0, kind: input, shape index: {}]   ;;  %s2767_s1 = inlined_call_operand.hbm [shape: bf16[64,64], index: 1, kind: input, shape index: {}]   ;;  %s2768_s2 = inlined_call_operand.vmem [shape: f32[64,1], index: 2, kind: input, shape index: {}]   ;;  %s2769_s3 = inlined_call_operand.hbm [shape: f32[128,128], index: 3, kind: input, shape index: {}]   ;;  %s2770_s4 = inlined_call_operand.vmem [shape: f32[1,128], index: 4, kind: input, shape index: {}]   ;;  %s2771_s5 = inlined_call_operand.vmem [shape: f32[3,128], index: 5, kind: input, shape index: {}]   ;;  %s2772_s6 = inlined_call_operand.vmem [shape: f32[3,128], index: 6, kind: input, shape index: {}]   ;;  %s2773_s7 = inlined_call_operand.hbm [shape: f32[256,128], index: 7, kind: input, shape index: {}]   ;;  %s2774_s8 = inlined_call_operand.vmem [shape: f32[2,128], index: 8, kind: input, shape index: {}]   ;;  %s2775_s9 = inlined_call_operand.hbm [shape: f32[64,128], index: 9, kind: output, shape index: {}]  }
   0x1   :  { %15 = vsyncpa [#allocation9], 0 }
   0x2   :  { %16 = vsyncpa [#allocation7], 0  ;;  %s2475_s30 = smov 0   ;;  %s2477_s10 = smov 0  }
   0x3   :  { %s2479_s11 = smov 0  }
   0x4 LB: > { %2783 = sst [smem:[#allocation15_spill]] %s2407_s10  ;;  %s2413_s12 = smov [#allocation8]   ;;  %s2411_s11 = sphi %s2479_s11, %s22_s11   ;;  %s2407_s10 = sphi %s2477_s10, %s2796_s10   ;;  %s2403_s30 = sphi %s2475_s30, %s2795_s30  }
   0x5   : > { %s304_s13 = sshll.u32 %s2413_s12, 4  ;;  %s2778_s14 = sadd.s32 4294967295, %s2411_s11   ;;  %s2499_s13 = int_to_ptr.vmem [resolvable:$true] %s304_s13 }
   0x6   : > { %p1678_p0 = scmp.ge.s32.totalorder %s2411_s11, 1  ;;  %p264_p1 = scmp.lt.s32.totalorder %s2411_s11, 4 }
   0x7   : > { %p2495_p2 = scmp.eq.s32.totalorder %s2778_s14, 0  ;;  %s34_s18 = sadd.s32 1, %s2407_s10 }
   0x8   : > { %p2501_p3 = pnand %p1678_p0, %p264_p1  ;;  %p2514_p6 = scmp.ge.s32.totalorder %s34_s18, 3 }
   0x9   : > { %s2784_s15 = scalar_select %p2495_p2, 1, 0 }
   0xa   : > { %s2785_s16 = scalar_select %p2501_p3, 1, 0 }
   0xb   : > { %p2209_p4 = pneg %p2501_p3  ;;  %s2414_s20 = smov [#allocation5]  }
   0xc   : > { %s288_s21 = sshll.u32 %s2414_s20, 4  ;;  %s2267_s24 = scalar_lea.hbm %s2769_s3, 2048  ;;  %s289_s21 = int_to_ptr.vmem [resolvable:$true] %s288_s21 }
   0xd   : > { %p2509_p5 = pnand %p2495_p2, %p2209_p4  ;;  %p2268_p7 = scmp.ne.s32.totalorder %s2769_s3, %s2267_s24 }
   0xe   : > { %p2274_p11 = scmp.lt.u32.totalorder %s2267_s24, %s2769_s3 }
   0xf   : > { %p2526_p8 = pneg %p2509_p5 }
  0x11   : > { %p2270_p9 = pnand %p2526_p8, %p2268_p7 }
  0x13   : > { %p2271_p10 = pneg %p2270_p9 }
  0x15   : > { %p2276_p12 = pnand %p2274_p11, %p2271_p10 }
  0x17   : > { %2279 = shalt.err (!%p2276_p12)
}
  0x18   : > { %s2280_s12 = scalar_lea.vmem %s2499_s13, 2048  ;;  %p2288_p4 = scmp.lt.s32.totalorder %s2499_s13, %s2499_s13 }
  0x19   : > { %p2281_p13 = scmp.ne.s32.totalorder %s2499_s13, %s2280_s12  ;;  %p2289_p2 = scmp.lt.s32.totalorder %s2280_s12, %s2280_s12 }
  0x1b   : > { %p2283_p0 = pnand %p2281_p13, %p2526_p8  ;;  %p2290_p7 = por %p2289_p2, %p2288_p4 }
  0x1d   : > { %p2284_p1 = pneg %p2283_p0 }
  0x1f   : > { %p2291_p9 = pnand %p2290_p7, %p2284_p1 }
  0x21   : > { %2294 = shalt.err (!%p2291_p9)
}
  0x22   : > { %s2781_s20 = smov 128   ;;  %s2782_s22 = smov 8  }
  0x23   : > { %2215 = dma.hbm_to_vmem [thread:$0]  (!%p2509_p5), %s2769_s3, 2048, %s2499_s13, [#allocation9], %s2781_s20, %s2781_s20, %s2782_s22  }
  0x24   : > { %s2798_s18 = smov (%p2514_p6, %s34_s18), 0  ;;  %s2295_s28 = scalar_lea.hbm %s2767_s1, 512 }
  0x25   : > { %p2296_p2 = scmp.ne.s32.totalorder %s2767_s1, %s2295_s28  ;;  %p2302_p12 = scmp.lt.u32.totalorder %s2295_s28, %s2767_s1 }
  0x27   : > { %p2298_p10 = pnand %p2296_p2, %p2526_p8 }
  0x29   : > { %p2299_p11 = pneg %p2298_p10 }
  0x2b   : > { %p2304_p13 = pnand %p2302_p12, %p2299_p11 }
  0x2d   : > { %2307 = shalt.err (!%p2304_p13)
}
  0x2e   : > { %s2308_s13 = scalar_lea.vmem %s289_s21, 512  ;;  %p2316_p4 = scmp.lt.s32.totalorder %s289_s21, %s289_s21 }
  0x2f   : > { %p2309_p6 = scmp.ne.s32.totalorder %s289_s21, %s2308_s13  ;;  %p2317_p7 = scmp.lt.s32.totalorder %s2308_s13, %s2308_s13 }
  0x31   : > { %p2311_p0 = pnand %p2309_p6, %p2526_p8  ;;  %p2318_p9 = por %p2317_p7, %p2316_p4 }
  0x33   : > { %p2312_p1 = pneg %p2311_p0 }
  0x35   : > { %p2319_p3 = pnand %p2318_p9, %p2312_p1 }
  0x37   : > { %2322 = shalt.err (!%p2319_p3)
}
  0x38   : > { %s2417_s19 = smov 64   ;;  %s2418_s23 = smov 4  }
  0x39   : > { %2212 = dma.hbm_to_vmem [thread:$0]  (!%p2509_p5), %s2767_s1, 512, %s289_s21, [#allocation6], %s2417_s19, %s2417_s19, %s2418_s23  }
  0x3a   : > { %s2419_s24 = smov [#allocation10]   ;;  %s2323_s29 = scalar_lea.hbm %s2773_s7, 4096 }
  0x3b   : > { %s326_s25 = sshll.u32 %s2419_s24, 4  ;;  %p2324_p3 = scmp.ne.s32.totalorder %s2773_s7, %s2323_s29  ;;  %s327_s25 = int_to_ptr.vmem [resolvable:$true] %s326_s25 }
  0x3c   : > { %p2330_p11 = scmp.lt.u32.totalorder %s2323_s29, %s2773_s7 }
  0x3d   : > { %p2326_p2 = pnand %p2324_p3, %p2526_p8 }
  0x3f   : > { %p2327_p10 = pneg %p2326_p2 }
  0x41   : > { %p2332_p12 = pnand %p2330_p11, %p2327_p10 }
  0x43   : > { %2335 = shalt.err (!%p2332_p12)
}
  0x44   : > { %s2336_s21 = scalar_lea.vmem %s327_s25, 4096  ;;  %p2344_p1 = scmp.lt.s32.totalorder %s327_s25, %s327_s25 }
  0x45   : > { %p2337_p13 = scmp.ne.s32.totalorder %s327_s25, %s2336_s21  ;;  %p2345_p4 = scmp.lt.s32.totalorder %s2336_s21, %s2336_s21 }
  0x47   : > { %p2339_p6 = pnand %p2337_p13, %p2526_p8  ;;  %p2346_p7 = por %p2345_p4, %p2344_p1 }
  0x49   : > { %p2340_p0 = pneg %p2339_p6 }
  0x4b   : > { %p2347_p9 = pnand %p2346_p7, %p2340_p0 }
  0x4d   : > { %2350 = shalt.err (!%p2347_p9)
}
  0x4e   : > { %s2789_s19 = smov 8   ;;  %s2790_s23 = smov 128  }
  0x4f   : > { %2218 = dma.hbm_to_vmem [thread:$0]  (!%p2509_p5), %s2773_s7, 4096, %s327_s25, [#allocation9], %s2790_s23, %s2790_s23, %s2789_s19  }
  0x50   : > { %p2791_p3 = scmp.ne.s32.totalorder %s2785_s16, 0 }
  0x51   : > { %p2792_p8 = scmp.ne.s32.totalorder (!%p2791_p3), %s2784_s15, 0 }
  0x52   : > { %345 = sbr.rel (%p2791_p3) target bundleno = 1600 (0x640), region = 56 }
  0x59   : > { %2390 = dma.done.wait (%p2792_p8), [#allocation6], 512  }
  0x5a   : > { %2392 = vsyncadd (%p2792_p8), [#allocation6], 4294966784 }
  0x5b   : > { %2394 = dma.done.wait (%p2792_p8), [#allocation9], 6144  }
  0x5c   : > { %2396 = vsyncadd (%p2792_p8), [#allocation9], 4294961152  ;;  %p1687_p2 = scmp.ne.s32.totalorder %s2403_s30, 0 }
  0x5d   : > { %v405_v0 = vld [vmem:[#allocation8] sm:$0xff] (!%p1687_p2)  ;;  %v406_v1 = vld [vmem:[#allocation8 + $0x8] sm:$0xff] (!%p1687_p2)  ;;  %v407_v2 = vld [vmem:[#allocation8 + $0x10] sm:$0xff] (!%p1687_p2) }
  0x5e   : > { %396 = sbr.rel (%p1687_p2) target bundleno = 360 (0x168), region = 72  ;;  %v2049_v3 = vpack.c.bf16 (!%p1687_p2), %v406_v1, %v405_v0  ;;  %v408_v4 = vld [vmem:[#allocation8 + $0x18] sm:$0xff] (!%p1687_p2)  ;;  %v409_v6 = vld [vmem:[#allocation8 + $0x20] sm:$0xff] (!%p1687_p2)  ;;  %v410_v7 = vld [vmem:[#allocation8 + $0x28] sm:$0xff] (!%p1687_p2) }
  0x5f   : > { %v2053_v5 = vpack.c.bf16 (!%p1687_p2), %v408_v4, %v407_v2  ;;  %v2057_v8 = vpack.c.bf16 (!%p1687_p2), %v410_v7, %v409_v6  ;;  %v397_v9 = vld [vmem:[%s2766_s0] sm:$0xff] (!%p1687_p2)  ;;  %v411_v11 = vld [vmem:[#allocation8 + $0x30] sm:$0xff] (!%p1687_p2)  ;;  %v412_v12 = vld [vmem:[#allocation8 + $0x38] sm:$0xff] (!%p1687_p2) }
  0x60   : > { %2050 = vmatprep.subr.bf16.mxu0 (!%p1687_p2), %v2049_v3  ;;  %2177 = vmatprep.subr.bf16.mxu1 (!%p1687_p2), %v2049_v3  ;;  %v401_v10 = vld [vmem:[%s2766_s0 + $0x20] sm:$0xff] (!%p1687_p2)  ;;  %v2061_v13 = vpack.c.bf16 (!%p1687_p2), %v412_v12, %v411_v11  ;;  %v414_v15 = vld [vmem:[#allocation8 + $0x48] sm:$0xff] (!%p1687_p2)  ;;  %v415_v17 = vld [vmem:[#allocation8 + $0x50] sm:$0xff] (!%p1687_p2) }
  0x61   : > { %2052 = vmatpush3.bf16.msra.mxu0 (!%p1687_p2), %v2049_v3  ;;  %2185 = vmatpush3.bf16.msra.mxu1 (!%p1687_p2), %v2049_v3  ;;  %v413_v14 = vld [vmem:[#allocation8 + $0x40] sm:$0xff] (!%p1687_p2)  ;;  %v416_v18 = vld [vmem:[#allocation8 + $0x58] sm:$0xff] (!%p1687_p2)  ;;  %v418_v21 = vld [vmem:[#allocation8 + $0x68] sm:$0xff] (!%p1687_p2) }
  0x62   : > { %2054 = vmatprep.subr.bf16.mxu0 (!%p1687_p2), %v2053_v5  ;;  %2178 = vmatprep.subr.bf16.mxu1 (!%p1687_p2), %v2053_v5  ;;  %v2065_v16 = vpack.c.bf16 (!%p1687_p2), %v414_v15, %v413_v14  ;;  %v2069_v19 = vpack.c.bf16 (!%p1687_p2), %v416_v18, %v415_v17  ;;  %v417_v20 = vld [vmem:[#allocation8 + $0x60] sm:$0xff] (!%p1687_p2)  ;;  %v419_v23 = vld [vmem:[#allocation8 + $0x70] sm:$0xff] (!%p1687_p2)  ;;  %v420_v24 = vld [vmem:[#allocation8 + $0x78] sm:$0xff] (!%p1687_p2) }
  0x63   : > { %1893 = vmatprep.mubr.f32.mxu0 (!%p1687_p2), %v397_v9  ;;  %1899 = vmatprep.mubr.f32.mxu1 (!%p1687_p2), %v401_v10  ;;  %v2073_v22 = vpack.c.bf16 (!%p1687_p2), %v418_v21, %v417_v20  ;;  %v2077_v25 = vpack.c.bf16 (!%p1687_p2), %v420_v24, %v419_v23  ;;  %v398_v26 = vld [vmem:[%s2766_s0 + $0x8] sm:$0xff] (!%p1687_p2)  ;;  %v399_v28 = vld [vmem:[%s2766_s0 + $0x10] sm:$0xff] (!%p1687_p2)  ;;  %v400_v30 = vld [vmem:[%s2766_s0 + $0x18] sm:$0xff] (!%p1687_p2) }
  0x64   : > { %v402_v27 = vld [vmem:[%s2766_s0 + $0x28] sm:$0xff] (!%p1687_p2)  ;;  %v403_v29 = vld [vmem:[%s2766_s0 + $0x30] sm:$0xff] (!%p1687_p2)  ;;  %v404_v31 = vld [vmem:[%s2766_s0 + $0x38] sm:$0xff] (!%p1687_p2) }
  0x65   : > { %2056 = vmatpush3.bf16.msra.mxu0 %v2053_v5  ;;  %2186 = vmatpush3.bf16.msra.mxu1 %v2053_v5  ;;  %v1688_v32 = vld [vmem:[%s2770_s4] ss:$0 sm:$0xff] }
  0x66   : > { %2058 = vmatprep.subr.bf16.mxu0 %v2057_v8  ;;  %2179 = vmatprep.subr.bf16.mxu1 %v2057_v8  ;;  %v1689_v34 = vld [vmem:[%s2771_s5] ss:$0 sm:$0xff] }
  0x67   : > { %v1690_v40 = vld [vmem:[%s2772_s6] ss:$0 sm:$0xff] }
  0x69   : > { %2060 = vmatpush3.bf16.msra.mxu0 %v2057_v8  ;;  %2187 = vmatpush3.bf16.msra.mxu1 %v2057_v8 }
  0x6a   : > { %2062 = vmatprep.subr.bf16.mxu0 %v2061_v13  ;;  %2180 = vmatprep.subr.bf16.mxu1 %v2061_v13 }
  0x6d   : > { %2064 = vmatpush3.bf16.msra.mxu0 %v2061_v13  ;;  %2188 = vmatpush3.bf16.msra.mxu1 %v2061_v13 }
  0x6e   : > { %2066 = vmatprep.subr.bf16.mxu0 %v2065_v16  ;;  %2181 = vmatprep.subr.bf16.mxu1 %v2065_v16 }
  0x71   : > { %2068 = vmatpush3.bf16.msra.mxu0 %v2065_v16  ;;  %2189 = vmatpush3.bf16.msra.mxu1 %v2065_v16 }
  0x72   : > { %2070 = vmatprep.subr.bf16.mxu0 %v2069_v19  ;;  %2182 = vmatprep.subr.bf16.mxu1 %v2069_v19 }
  0x75   : > { %2072 = vmatpush3.bf16.msra.mxu0 %v2069_v19  ;;  %2190 = vmatpush3.bf16.msra.mxu1 %v2069_v19 }
  0x76   : > { %2074 = vmatprep.subr.bf16.mxu0 %v2073_v22  ;;  %2183 = vmatprep.subr.bf16.mxu1 %v2073_v22 }
  0x79   : > { %2076 = vmatpush3.bf16.msra.mxu0 %v2073_v22  ;;  %2191 = vmatpush3.bf16.msra.mxu1 %v2073_v22 }
  0x7a   : > { %2078 = vmatprep.subr.bf16.mxu0 %v2077_v25  ;;  %2184 = vmatprep.subr.bf16.mxu1 %v2077_v25 }
  0x7d   : > { %2080 = vmatpush3.bf16.msra.mxu0 %v2077_v25  ;;  %2192 = vmatpush3.bf16.msra.mxu1 %v2077_v25 }
  0x80   : > { %1894 = vmatmul.mubr.f32.vlgmr.msra.gmra.mrb[0].mxu0 %v398_v26  ;;  %1900 = vmatmul.mubr.f32.vlgmr.msra.gmra.mrb[0].mxu1 %v402_v27 }
  0x81   : > { %1896 = vmatprep.mubr.f32.mxu0 %v399_v28  ;;  %1902 = vmatprep.mubr.f32.mxu1 %v403_v29 }
  0x84   : > { %1897 = vmatmul.mubr.f32.gmra.mrb[2].mxu0 %v400_v30  ;;  %1903 = vmatmul.mubr.f32.gmra.mrb[2].mxu1 %v404_v31 }
 0x153   : > { %v1895_v33 = vpop.f32.mrb[0].mxu0  ;;  %v1901_v35 = vpop.f32.mrb[0].mxu1 }
 0x154   : > { %v500_v36 = vadd.f32 %v1895_v33, %v1688_v32  ;;  %v520_v37 = vadd.f32 %v1901_v35, %v1688_v32  ;;  %v494_v38 = vpop.f32.mrb[1].mxu0  ;;  %v514_v39 = vpop.f32.mrb[1].mxu1 }
 0x155   : > { %v495_v41 = vadd.f32 %v1688_v32, %v494_v38  ;;  %v515_v42 = vadd.f32 %v1688_v32, %v514_v39 }
 0x156   : > { %v539_v43 = vmul.f32 %v1689_v34, %v500_v36  ;;  %v543_v44 = vmul.f32 %v1689_v34, %v520_v37 }
 0x157   : > { %v538_v45 = vmul.f32 %v1689_v34, %v495_v41  ;;  %v542_v46 = vmul.f32 %v1689_v34, %v515_v42  ;;  %v1898_v47 = vpop.f32.mrb[2].mxu0  ;;  %v1904_v48 = vpop.f32.mrb[2].mxu1 }
 0x158   : > { %v552_v49 = vadd.f32 %v1690_v40, %v539_v43  ;;  %v556_v50 = vadd.f32 %v1690_v40, %v543_v44  ;;  %v510_v51 = vadd.f32 %v1898_v47, %v1688_v32  ;;  %v530_v52 = vadd.f32 %v1904_v48, %v1688_v32  ;;  %v504_v53 = vpop.f32.mrb[3].mxu0  ;;  %v524_v54 = vpop.f32.mrb[3].mxu1 }
 0x159   : > { %v551_v55 = vadd.f32 %v1690_v40, %v538_v45  ;;  %v555_v56 = vadd.f32 %v1690_v40, %v542_v46  ;;  %v505_v57 = vadd.f32 %v1688_v32, %v504_v53  ;;  %v525_v58 = vadd.f32 %v1688_v32, %v524_v54 }
 0x15a   : > { %v560_v59 = vmax.f32 %v552_v49, 0.0  ;;  %v564_v60 = vmax.f32 %v556_v50, 0.0  ;;  %v541_v61 = vmul.f32 %v1689_v34, %v510_v51  ;;  %v545_v62 = vmul.f32 %v1689_v34, %v530_v52 }
 0x15b   : > { %v559_v63 = vmax.f32 %v551_v55, 0.0  ;;  %v563_v0 = vmax.f32 %v555_v56, 0.0  ;;  %v540_v1 = vmul.f32 %v1689_v34, %v505_v57  ;;  %v544_v2 = vmul.f32 %v1689_v34, %v525_v58 }
 0x15c   : > { %569 = vst [vmem:[#allocation2 + $0x8] sm:$0xff] %v560_v59  ;;  %578 = vst [vmem:[#allocation3 + $0x8] sm:$0xff] %v560_v59  ;;  %v554_v3 = vadd.f32 %v1690_v40, %v541_v61  ;;  %v558_v4 = vadd.f32 %v1690_v40, %v545_v62 }
 0x15d   : > { %586 = vst [vmem:[#allocation11 + $0x8] sm:$0xff] %v560_v59  ;;  %573 = vst [vmem:[#allocation2 + $0x28] sm:$0xff] %v564_v60  ;;  %v553_v5 = vadd.f32 %v1690_v40, %v540_v1  ;;  %v557_v6 = vadd.f32 %v1690_v40, %v544_v2 }
 0x15e   : > { %582 = vst [vmem:[#allocation3 + $0x28] sm:$0xff] %v564_v60  ;;  %590 = vst [vmem:[#allocation11 + $0x28] sm:$0xff] %v564_v60  ;;  %v562_v7 = vmax.f32 %v554_v3, 0.0  ;;  %v566_v8 = vmax.f32 %v558_v4, 0.0 }
 0x15f   : > { %568 = vst [vmem:[#allocation2] sm:$0xff] %v559_v63  ;;  %577 = vst [vmem:[#allocation3] sm:$0xff] %v559_v63  ;;  %v561_v9 = vmax.f32 %v553_v5, 0.0  ;;  %v565_v10 = vmax.f32 %v557_v6, 0.0 }
 0x160   : > { %585 = vst [vmem:[#allocation11] sm:$0xff] %v559_v63  ;;  %572 = vst [vmem:[#allocation2 + $0x20] sm:$0xff] %v563_v0 }
 0x161   : > { %581 = vst [vmem:[#allocation3 + $0x20] sm:$0xff] %v563_v0  ;;  %589 = vst [vmem:[#allocation11 + $0x20] sm:$0xff] %v563_v0 }
 0x162   : > { %571 = vst [vmem:[#allocation2 + $0x18] sm:$0xff] %v562_v7  ;;  %580 = vst [vmem:[#allocation3 + $0x18] sm:$0xff] %v562_v7 }
 0x163   : > { %588 = vst [vmem:[#allocation11 + $0x18] sm:$0xff] %v562_v7  ;;  %575 = vst [vmem:[#allocation2 + $0x38] sm:$0xff] %v566_v8 }
 0x164   : > { %584 = vst [vmem:[#allocation3 + $0x38] sm:$0xff] %v566_v8  ;;  %592 = vst [vmem:[#allocation11 + $0x38] sm:$0xff] %v566_v8 }
 0x165   : > { %570 = vst [vmem:[#allocation2 + $0x10] sm:$0xff] %v561_v9  ;;  %579 = vst [vmem:[#allocation3 + $0x10] sm:$0xff] %v561_v9 }
 0x166   : > { %587 = vst [vmem:[#allocation11 + $0x10] sm:$0xff] %v561_v9  ;;  %574 = vst [vmem:[#allocation2 + $0x30] sm:$0xff] %v565_v10 }
 0x167   : > { %583 = vst [vmem:[#allocation3 + $0x30] sm:$0xff] %v565_v10  ;;  %591 = vst [vmem:[#allocation11 + $0x30] sm:$0xff] %v565_v10 }
 0x168 PF: > { %p1691_p5 = scmp.ne.s32.totalorder %s2403_s30, 1 }
 0x169   : > { %v603_v11 = vld [vmem:[%s2768_s2 + $0x10] sm:$0xff] (!%p1691_p5)  ;;  %v601_v12 = vld [vmem:[%s2768_s2] sm:$0xff] (!%p1691_p5)  ;;  %v2420_v13 = vmov (!%p1691_p5), 0   ;;  %v604_v14 = vld [vmem:[%s2768_s2 + $0x18] sm:$0xff] (!%p1691_p5)  ;;  %vm697_vm0 = vcmask (!%p1691_p5), 523264  }
 0x16a   : > { %596 = sbr.rel (%p1691_p5) target bundleno = 967 (0x3c7), region = 76  ;;  %2264 = vset.pattern.permute.xlu1 (!%p1691_p5), %v2420_v13  ;;  %2263 = vset.pattern.permute.xlu0 (!%p1691_p5), %v2420_v13  ;;  %v602_v15 = vld [vmem:[%s2768_s2 + $0x8] sm:$0xff] (!%p1691_p5)  ;;  %v605_v17 = vld [vmem:[%s2768_s2 + $0x20] sm:$0xff] (!%p1691_p5)  ;;  %v608_v18 = vld [vmem:[%s2768_s2 + $0x38] sm:$0xff] (!%p1691_p5) }
 0x16b   : > { %629 = vperm.xlu1 (!%p1691_p5), %2264, %v603_v11   ;;  %619 = vperm.xlu0 (!%p1691_p5), %2263, %v601_v12   ;;  %v606_v16 = vld [vmem:[%s2768_s2 + $0x28] sm:$0xff] (!%p1691_p5)  ;;  %v607_v19 = vld [vmem:[%s2768_s2 + $0x30] sm:$0xff] (!%p1691_p5)  ;;  %v2662_v20 = vld [vmem:[#allocation5] sm:$0xff] (!%p1691_p5)  }
 0x16c   : > { %v1721_v21 = vunpack.c.l.bf16 (!%p1691_p5), %v2662_v20  ;;  %v884_v22 = vld [vmem:[#allocation10] sm:$0xff] (!%p1691_p5)  ;;  %v885_v23 = vld [vmem:[#allocation10 + $0x8] sm:$0xff] (!%p1691_p5)  ;;  %v886_v24 = vld [vmem:[#allocation10 + $0x10] sm:$0xff] (!%p1691_p5)  ;;  %v1722_v8 = vunpack.c.h.bf16 (!%p1691_p5), %v2662_v20 }
 0x16d   : > { %v2097_v25 = vpack.c.bf16 (!%p1691_p5), %v885_v23, %v884_v22  ;;  %v887_v26 = vld [vmem:[#allocation10 + $0x18] sm:$0xff] (!%p1691_p5)  ;;  %v888_v28 = vld [vmem:[#allocation10 + $0x20] sm:$0xff] (!%p1691_p5)  ;;  %v889_v29 = vld [vmem:[#allocation10 + $0x28] sm:$0xff] (!%p1691_p5) }
 0x16e   : > { %1921 = vmatprep.mubr.msk.f32.mxu0 (!%p1691_p5), %vm697_vm0, %v1721_v21  ;;  %v2101_v27 = vpack.c.bf16 (!%p1691_p5), %v887_v26, %v886_v24  ;;  %v2105_v30 = vpack.c.bf16 (!%p1691_p5), %v889_v29, %v888_v28  ;;  %v890_v31 = vld [vmem:[#allocation10 + $0x30] sm:$0xff] (!%p1691_p5)  ;;  %v891_v32 = vld [vmem:[#allocation10 + $0x38] sm:$0xff] (!%p1691_p5)  ;;  %v892_v34 = vld [vmem:[#allocation10 + $0x40] sm:$0xff] (!%p1691_p5) }
 0x16f   : > { %634 = vperm.xlu1 (!%p1691_p5), %2264, %v604_v14   ;;  %624 = vperm.xlu0 (!%p1691_p5), %2263, %v602_v15   ;;  %v2109_v33 = vpack.c.bf16 (!%p1691_p5), %v891_v32, %v890_v31  ;;  %v893_v35 = vld [vmem:[#allocation10 + $0x48] sm:$0xff] (!%p1691_p5)  ;;  %v894_v37 = vld [vmem:[#allocation10 + $0x50] sm:$0xff] (!%p1691_p5)  ;;  %v895_v38 = vld [vmem:[#allocation10 + $0x58] sm:$0xff] (!%p1691_p5) }
 0x170   : > { %2098 = vmatprep.subr.bf16.mxu1 (!%p1691_p5), %v2097_v25  ;;  %v2113_v36 = vpack.c.bf16 (!%p1691_p5), %v893_v35, %v892_v34  ;;  %v2117_v39 = vpack.c.bf16 (!%p1691_p5), %v895_v38, %v894_v37  ;;  %v896_v40 = vld [vmem:[#allocation10 + $0x60] sm:$0xff] (!%p1691_p5)  ;;  %v897_v41 = vld [vmem:[#allocation10 + $0x68] sm:$0xff] (!%p1691_p5)  ;;  %v611_v43 = vld [vmem:[#allocation3 + $0x10] sm:$0xff] (!%p1691_p5) }
 0x171   : > { %2100 = vmatpush3.bf16.msra.mxu1 %v2097_v25  ;;  %v2121_v42 = vpack.c.bf16 %v897_v41, %v896_v40  ;;  %v609_v44 = vld [vmem:[#allocation3] sm:$0xff]  ;;  %v612_v49 = vld [vmem:[#allocation3 + $0x18] sm:$0xff]  ;;  %v610_v50 = vld [vmem:[#allocation3 + $0x8] sm:$0xff] }
 0x172   : > { %2102 = vmatprep.subr.bf16.mxu1 %v2101_v27  ;;  %v614_v55 = vld [vmem:[#allocation3 + $0x28] sm:$0xff]  ;;  %v613_v56 = vld [vmem:[#allocation3 + $0x20] sm:$0xff]  ;;  %v616_v63 = vld [vmem:[#allocation3 + $0x38] sm:$0xff] }
 0x173   : > { %644 = vperm.xlu1 %2264, %v606_v16   ;;  %639 = vperm.xlu0 %2263, %v605_v17   ;;  %v615_v0 = vld [vmem:[#allocation3 + $0x30] sm:$0xff]  ;;  %v1751_v7 = vld [vmem:[#allocation5 + $0x8] sm:$0xff]   ;;  %v1753_v13 = vld [vmem:[#allocation5 + $0x18] sm:$0xff]  }
 0x174   : > { %v1725_v9 = vunpack.c.l.bf16 %v1751_v7  ;;  %v1752_v10 = vld [vmem:[#allocation5 + $0x10] sm:$0xff]  }
 0x175   : > { %2104 = vmatpush3.bf16.msra.mxu1 %v2101_v27 }
 0x176   : > { %2106 = vmatprep.subr.bf16.mxu1 %v2105_v30 }
 0x177   : > { %654 = vperm.xlu1 %2264, %v608_v18   ;;  %649 = vperm.xlu0 %2263, %v607_v19  }
 0x179   : > { %2108 = vmatpush3.bf16.msra.mxu1 %v2105_v30 }
 0x17a   : > { %2110 = vmatprep.subr.bf16.mxu1 %v2109_v33 }
 0x17b   : > { %843 = vperm.xlu1 %2264, %v602_v15   ;;  %838 = vperm.xlu0 %2263, %v601_v12   ;;  %v1729_v12 = vunpack.c.l.bf16 %v1752_v10  ;;  %v1733_v15 = vunpack.c.l.bf16 %v1753_v13 }
 0x17d   : > { %2112 = vmatpush3.bf16.msra.mxu1 %v2109_v33 }
 0x17e   : > { %2114 = vmatprep.subr.bf16.mxu1 %v2113_v36 }
 0x17f   : > { %853 = vperm.xlu1 %2264, %v604_v14   ;;  %848 = vperm.xlu0 %2263, %v603_v11   ;;  %v1726_v11 = vunpack.c.h.bf16 %v1751_v7  ;;  %v1730_v14 = vunpack.c.h.bf16 %v1752_v10  ;;  %v1048_v7 = vld [vmem:[#allocation2 + $0x18] sm:$0xff] }
 0x181   : > { %2116 = vmatpush3.bf16.msra.mxu1 %v2113_v36 }
 0x182   : > { %2118 = vmatprep.subr.bf16.mxu1 %v2117_v39 }
 0x183   : > { %863 = vperm.xlu1 %2264, %v606_v16   ;;  %858 = vperm.xlu0 %2263, %v605_v17   ;;  %v1734_v16 = vunpack.c.h.bf16 %v1753_v13  ;;  %v898_v17 = vld [vmem:[#allocation10 + $0x70] sm:$0xff] }
 0x185   : > { %2120 = vmatpush3.bf16.msra.mxu1 %v2117_v39 }
 0x186   : > { %2122 = vmatprep.subr.bf16.mxu1 %v2121_v42 }
 0x187   : > { %873 = vperm.xlu1 %2264, %v608_v18   ;;  %868 = vperm.xlu0 %2263, %v607_v19   ;;  %v899_v18 = vld [vmem:[#allocation10 + $0x78] sm:$0xff] }
 0x188   : > { %v2125_v19 = vpack.c.bf16 %v899_v18, %v898_v17 }
 0x189   : > { %2124 = vmatpush3.bf16.msra.mxu1 %v2121_v42 }
 0x18a   : > { %2126 = vmatprep.subr.bf16.mxu1 %v2125_v19 }
 0x18d   : > { %2128 = vmatpush3.bf16.msra.mxu1 %v2125_v19 }
 0x1ea   : > { %v630_v45 = vpop.permute.xlu1 %629  ;;  %v620_v46 = vpop.permute.xlu0 %619 }
 0x1eb   : > { %v659_v47 = vmul.f32 %v630_v45, %v611_v43  ;;  %v657_v48 = vmul.f32 %v620_v46, %v609_v44  ;;  %v1700_v44 = vld [vmem:[%s2774_s8] ss:$0 sm:$0xff]  ;;  %v1701_v46 = vld [vmem:[%s2771_s5 + $0x1] ss:$0 sm:$0xff] }
 0x1ee   : > { %v635_v51 = vpop.permute.xlu1 %634  ;;  %v625_v52 = vpop.permute.xlu0 %624 }
 0x1ef   : > { %v660_v53 = vmul.f32 %v635_v51, %v612_v49  ;;  %v658_v54 = vmul.f32 %v625_v52, %v610_v50  ;;  %v1702_v49 = vld [vmem:[%s2772_s6 + $0x1] ss:$0 sm:$0xff] }
 0x1f1   : > { %v2081_v57 = vpack.c.bf16 %v658_v54, %v657_v48  ;;  %v2085_v62 = vpack.c.bf16 %v660_v53, %v659_v47 }
 0x1f2   : > { %v645_v58 = vpop.permute.xlu1 %644  ;;  %v640_v59 = vpop.permute.xlu0 %639 }
 0x1f3   : > { %v662_v60 = vmul.f32 %v645_v58, %v614_v55  ;;  %v661_v61 = vmul.f32 %v640_v59, %v613_v56  ;;  %2082 = vmatprep.subr.bf16.mxu0 %v2081_v57 }
 0x1f4   : > { %2084 = vmatpush3.bf16.msra.mxu0 %v2081_v57  ;;  %v1046_v57 = vld [vmem:[#allocation2 + $0x8] sm:$0xff] }
 0x1f5   : > { %2086 = vmatprep.subr.bf16.mxu0 %v2085_v62  ;;  %v2089_v5 = vpack.c.bf16 %v662_v60, %v661_v61  ;;  %v1045_v61 = vld [vmem:[#allocation2] sm:$0xff] }
 0x1f6   : > { %v655_v1 = vpop.permute.xlu1 %654  ;;  %v650_v2 = vpop.permute.xlu0 %649 }
 0x1f7   : > { %v664_v3 = vmul.f32 %v655_v1, %v616_v63  ;;  %v663_v4 = vmul.f32 %v650_v2, %v615_v0 }
 0x1f8   : > { %2088 = vmatpush3.bf16.msra.mxu0 %v2085_v62 }
 0x1f9   : > { %2090 = vmatprep.subr.bf16.mxu0 %v2089_v5  ;;  %v2093_v6 = vpack.c.bf16 %v664_v3, %v663_v4 }
 0x1fa   : > { %v839_v20 = vpop.permute.xlu0 %838  ;;  %v844_v21 = vpop.permute.xlu1 %843 }
 0x1fc   : > { %2092 = vmatpush3.bf16.msra.mxu0 %v2089_v5 }
 0x1fd   : > { %2094 = vmatprep.subr.bf16.mxu0 %v2093_v6 }
 0x1fe   : > { %v849_v23 = vpop.permute.xlu0 %848  ;;  %v854_v25 = vpop.permute.xlu1 %853 }
 0x200   : > { %2096 = vmatpush3.bf16.msra.mxu0 %v2093_v6 }
 0x202   : > { %v859_v31 = vpop.permute.xlu0 %858  ;;  %v864_v33 = vpop.permute.xlu1 %863 }
 0x203   : > { %1922 = vmatmul.mubr.msk.f32.vlgmr.msra.gmra.mrb[0].mxu0 %vm697_vm0, %v1722_v8 }
 0x204   : > { %1924 = vmatprep.mubr.msk.f32.mxu0 %vm697_vm0, %v1725_v9 }
 0x206   : > { %v869_v39 = vpop.permute.xlu0 %868  ;;  %v874_v41 = vpop.permute.xlu1 %873 }
 0x207   : > { %1925 = vmatmul.mubr.msk.f32.gmra.mrb[2].mxu0 %vm697_vm0, %v1726_v11  ;;  %v1047_v11 = vld [vmem:[#allocation2 + $0x10] sm:$0xff] }
 0x208   : > { %1927 = vmatprep.mubr.msk.f32.mxu0 %vm697_vm0, %v1729_v12 }
 0x20b   : > { %1928 = vmatmul.mubr.msk.f32.gmra.mrb[4].mxu0 %vm697_vm0, %v1730_v14 }
 0x20c   : > { %1930 = vmatprep.mubr.msk.f32.mxu0 %vm697_vm0, %v1733_v15 }
 0x20f   : > { %1931 = vmatmul.mubr.msk.f32.gmra.mrb[6].mxu0 %vm697_vm0, %v1734_v16 }
 0x2d6   : > { %v1923_v22 = vpop.f32.mrb[0].mxu0 }
 0x2d7   : > { %v788_v24 = vpop.f32.mrb[1].mxu0  ;;  %v877_v27 = vmul.f32 %v1923_v22, %v844_v21  ;;  %v1050_v21 = vld [vmem:[#allocation2 + $0x28] sm:$0xff] }
 0x2d8   : > { %v876_v26 = vmul.f32 %v839_v20, %v788_v24 }
 0x2da   : > { %v1926_v28 = vpop.f32.mrb[2].mxu0  ;;  %1965 = vmatprep.mubr.f32.mxu1 %v876_v26 }
 0x2db   : > { %v798_v29 = vpop.f32.mrb[3].mxu0  ;;  %1966 = vmatmul.mubr.f32.vlgmr.msra.gmra.mrb[0].mxu1 %v877_v27  ;;  %v879_v32 = vmul.f32 %v1926_v28, %v854_v25  ;;  %v1049_v25 = vld [vmem:[#allocation2 + $0x20] sm:$0xff] }
 0x2dc   : > { %v878_v30 = vmul.f32 %v849_v23, %v798_v29 }
 0x2de   : > { %v1929_v34 = vpop.f32.mrb[4].mxu0  ;;  %1968 = vmatprep.mubr.f32.mxu1 %v878_v30 }
 0x2df   : > { %v808_v35 = vpop.f32.mrb[5].mxu0  ;;  %1969 = vmatmul.mubr.f32.gmra.mrb[2].mxu1 %v879_v32  ;;  %v881_v37 = vmul.f32 %v1929_v34, %v864_v33  ;;  %v1052_v32 = vld [vmem:[#allocation2 + $0x38] sm:$0xff] }
 0x2e0   : > { %v880_v36 = vmul.f32 %v859_v31, %v808_v35  ;;  %v1051_v35 = vld [vmem:[#allocation2 + $0x30] sm:$0xff] }
 0x2e2   : > { %v1932_v38 = vpop.f32.mrb[6].mxu0  ;;  %1971 = vmatprep.mubr.f32.mxu1 %v880_v36 }
 0x2e3   : > { %v818_v40 = vpop.f32.mrb[7].mxu0  ;;  %1972 = vmatmul.mubr.f32.gmra.mrb[4].mxu1 %v881_v37  ;;  %v883_v43 = vmul.f32 %v1932_v38, %v874_v41 }
 0x2e4   : > { %v882_v42 = vmul.f32 %v869_v39, %v818_v40 }
 0x2e6   : > { %1974 = vmatprep.mubr.f32.mxu1 %v882_v42 }
 0x2e7   : > { %1975 = vmatmul.mubr.f32.gmra.mrb[6].mxu1 %v883_v43 }
 0x3ae   : > { %v1967_v45 = vpop.f32.mrb[0].mxu1 }
 0x3af   : > { %v977_v47 = vadd.f32 %v1967_v45, %v1700_v44  ;;  %v971_v48 = vpop.f32.mrb[1].mxu1 }
 0x3b0   : > { %v972_v50 = vadd.f32 %v1700_v44, %v971_v48 }
 0x3b1   : > { %v1016_v51 = vmul.f32 %v1701_v46, %v977_v47 }
 0x3b2   : > { %v1015_v52 = vmul.f32 %v1701_v46, %v972_v50  ;;  %v1970_v53 = vpop.f32.mrb[2].mxu1 }
 0x3b3   : > { %v1029_v54 = vadd.f32 %v1702_v49, %v1016_v51  ;;  %v987_v55 = vadd.f32 %v1970_v53, %v1700_v44  ;;  %v981_v56 = vpop.f32.mrb[3].mxu1 }
 0x3b4   : > { %v1028_v58 = vadd.f32 %v1702_v49, %v1015_v52  ;;  %v982_v59 = vadd.f32 %v1700_v44, %v981_v56 }
 0x3b5   : > { %v1037_v60 = vmax.f32 %v1029_v54, 0.0  ;;  %v1018_v62 = vmul.f32 %v1701_v46, %v987_v55 }
 0x3b6   : > { %v1036_v63 = vmax.f32 %v1028_v58, 0.0  ;;  %v1017_v0 = vmul.f32 %v1701_v46, %v982_v59  ;;  %v1973_v1 = vpop.f32.mrb[4].mxu1 }
 0x3b7   : > { %v1054_v2 = vadd.f32 %v1046_v57, %v1037_v60  ;;  %v1031_v3 = vadd.f32 %v1702_v49, %v1018_v62  ;;  %v997_v4 = vadd.f32 %v1973_v1, %v1700_v44  ;;  %v991_v5 = vpop.f32.mrb[5].mxu1 }
 0x3b8   : > { %v1053_v6 = vadd.f32 %v1045_v61, %v1036_v63  ;;  %v1030_v8 = vadd.f32 %v1702_v49, %v1017_v0  ;;  %v992_v9 = vadd.f32 %v1700_v44, %v991_v5 }
 0x3b9   : > { %1063 = vst [vmem:[#allocation3 + $0x8] sm:$0xff] %v1054_v2  ;;  %1071 = vst [vmem:[#allocation11 + $0x8] sm:$0xff] %v1054_v2  ;;  %v1039_v10 = vmax.f32 %v1031_v3, 0.0  ;;  %v1020_v12 = vmul.f32 %v1701_v46, %v997_v4 }
 0x3ba   : > { %1062 = vst [vmem:[#allocation3] sm:$0xff] %v1053_v6  ;;  %1070 = vst [vmem:[#allocation11] sm:$0xff] %v1053_v6  ;;  %v1038_v13 = vmax.f32 %v1030_v8, 0.0  ;;  %v1019_v14 = vmul.f32 %v1701_v46, %v992_v9  ;;  %v1976_v15 = vpop.f32.mrb[6].mxu1 }
 0x3bb   : > { %v1056_v16 = vadd.f32 %v1048_v7, %v1039_v10  ;;  %v1033_v17 = vadd.f32 %v1702_v49, %v1020_v12  ;;  %v1007_v18 = vadd.f32 %v1976_v15, %v1700_v44  ;;  %v1001_v19 = vpop.f32.mrb[7].mxu1 }
 0x3bc   : > { %v1055_v20 = vadd.f32 %v1047_v11, %v1038_v13  ;;  %v1032_v22 = vadd.f32 %v1702_v49, %v1019_v14  ;;  %v1002_v23 = vadd.f32 %v1700_v44, %v1001_v19 }
 0x3bd   : > { %1065 = vst [vmem:[#allocation3 + $0x18] sm:$0xff] %v1056_v16  ;;  %1073 = vst [vmem:[#allocation11 + $0x18] sm:$0xff] %v1056_v16  ;;  %v1041_v24 = vmax.f32 %v1033_v17, 0.0  ;;  %v1022_v26 = vmul.f32 %v1701_v46, %v1007_v18 }
 0x3be   : > { %1064 = vst [vmem:[#allocation3 + $0x10] sm:$0xff] %v1055_v20  ;;  %1072 = vst [vmem:[#allocation11 + $0x10] sm:$0xff] %v1055_v20  ;;  %v1040_v27 = vmax.f32 %v1032_v22, 0.0  ;;  %v1021_v28 = vmul.f32 %v1701_v46, %v1002_v23 }
 0x3bf   : > { %v1058_v29 = vadd.f32 %v1050_v21, %v1041_v24  ;;  %v1035_v30 = vadd.f32 %v1702_v49, %v1022_v26 }
 0x3c0   : > { %v1057_v31 = vadd.f32 %v1049_v25, %v1040_v27  ;;  %v1034_v33 = vadd.f32 %v1702_v49, %v1021_v28 }
 0x3c1   : > { %1067 = vst [vmem:[#allocation3 + $0x28] sm:$0xff] %v1058_v29  ;;  %1075 = vst [vmem:[#allocation11 + $0x28] sm:$0xff] %v1058_v29  ;;  %v1043_v34 = vmax.f32 %v1035_v30, 0.0 }
 0x3c2   : > { %1066 = vst [vmem:[#allocation3 + $0x20] sm:$0xff] %v1057_v31  ;;  %1074 = vst [vmem:[#allocation11 + $0x20] sm:$0xff] %v1057_v31  ;;  %v1042_v36 = vmax.f32 %v1034_v33, 0.0 }
 0x3c3   : > { %v1060_v37 = vadd.f32 %v1052_v32, %v1043_v34 }
 0x3c4   : > { %v1059_v38 = vadd.f32 %v1051_v35, %v1042_v36 }
 0x3c5   : > { %1069 = vst [vmem:[#allocation3 + $0x38] sm:$0xff] %v1060_v37  ;;  %1077 = vst [vmem:[#allocation11 + $0x38] sm:$0xff] %v1060_v37 }
 0x3c6   : > { %1068 = vst [vmem:[#allocation3 + $0x30] sm:$0xff] %v1059_v38  ;;  %1076 = vst [vmem:[#allocation11 + $0x30] sm:$0xff] %v1059_v38 }
 0x3c7 PF: > { %p1703_p10 = scmp.ne.s32.totalorder %s2403_s30, 2 }
 0x3c8   : > { %v1088_v39 = vld [vmem:[%s2768_s2 + $0x10] sm:$0xff] (!%p1703_p10)  ;;  %v1086_v40 = vld [vmem:[%s2768_s2] sm:$0xff] (!%p1703_p10)  ;;  %v2421_v41 = vmov (!%p1703_p10), 0   ;;  %v1089_v42 = vld [vmem:[%s2768_s2 + $0x18] sm:$0xff] (!%p1703_p10)  ;;  %vm1182_vm1 = vcmask (!%p1703_p10), 523264  }
 0x3c9   : > { %1081 = sbr.rel (%p1703_p10) target bundleno = 1574 (0x626), region = 84  ;;  %2266 = vset.pattern.permute.xlu1 (!%p1703_p10), %v2421_v41  ;;  %2265 = vset.pattern.permute.xlu0 (!%p1703_p10), %v2421_v41  ;;  %v1087_v43 = vld [vmem:[%s2768_s2 + $0x8] sm:$0xff] (!%p1703_p10)  ;;  %v1090_v45 = vld [vmem:[%s2768_s2 + $0x20] sm:$0xff] (!%p1703_p10)  ;;  %v1093_v46 = vld [vmem:[%s2768_s2 + $0x38] sm:$0xff] (!%p1703_p10) }
 0x3ca   : > { %1114 = vperm.xlu1 (!%p1703_p10), %2266, %v1088_v39   ;;  %1104 = vperm.xlu0 (!%p1703_p10), %2265, %v1086_v40   ;;  %v1091_v44 = vld [vmem:[%s2768_s2 + $0x28] sm:$0xff] (!%p1703_p10)  ;;  %v1092_v47 = vld [vmem:[%s2768_s2 + $0x30] sm:$0xff] (!%p1703_p10)  ;;  %v2708_v48 = vld [vmem:[#allocation5] sm:$0xff] (!%p1703_p10)  }
 0x3cb   : > { %v1737_v49 = vunpack.c.l.bf16 (!%p1703_p10), %v2708_v48  ;;  %v1369_v50 = vld [vmem:[#allocation10 + $0x80] sm:$0xff] (!%p1703_p10)  ;;  %v1370_v51 = vld [vmem:[#allocation10 + $0x88] sm:$0xff] (!%p1703_p10)  ;;  %v1371_v52 = vld [vmem:[#allocation10 + $0x90] sm:$0xff] (!%p1703_p10)  ;;  %v1738_v36 = vunpack.c.h.bf16 (!%p1703_p10), %v2708_v48 }
 0x3cc   : > { %v2145_v53 = vpack.c.bf16 (!%p1703_p10), %v1370_v51, %v1369_v50  ;;  %v1372_v54 = vld [vmem:[#allocation10 + $0x98] sm:$0xff] (!%p1703_p10)  ;;  %v1373_v56 = vld [vmem:[#allocation10 + $0xa0] sm:$0xff] (!%p1703_p10)  ;;  %v1374_v57 = vld [vmem:[#allocation10 + $0xa8] sm:$0xff] (!%p1703_p10) }
 0x3cd   : > { %1993 = vmatprep.mubr.msk.f32.mxu0 (!%p1703_p10), %vm1182_vm1, %v1737_v49  ;;  %v2149_v55 = vpack.c.bf16 (!%p1703_p10), %v1372_v54, %v1371_v52  ;;  %v2153_v58 = vpack.c.bf16 (!%p1703_p10), %v1374_v57, %v1373_v56  ;;  %v1375_v59 = vld [vmem:[#allocation10 + $0xb0] sm:$0xff] (!%p1703_p10)  ;;  %v1376_v60 = vld [vmem:[#allocation10 + $0xb8] sm:$0xff] (!%p1703_p10)  ;;  %v1377_v62 = vld [vmem:[#allocation10 + $0xc0] sm:$0xff] (!%p1703_p10) }
 0x3ce   : > { %1119 = vperm.xlu1 (!%p1703_p10), %2266, %v1089_v42   ;;  %1109 = vperm.xlu0 (!%p1703_p10), %2265, %v1087_v43   ;;  %v2157_v61 = vpack.c.bf16 (!%p1703_p10), %v1376_v60, %v1375_v59  ;;  %v1378_v63 = vld [vmem:[#allocation10 + $0xc8] sm:$0xff] (!%p1703_p10)  ;;  %v1379_v1 = vld [vmem:[#allocation10 + $0xd0] sm:$0xff] (!%p1703_p10)  ;;  %v1380_v2 = vld [vmem:[#allocation10 + $0xd8] sm:$0xff] (!%p1703_p10) }
 0x3cf   : > { %2146 = vmatprep.subr.bf16.mxu1 (!%p1703_p10), %v2145_v53  ;;  %v2161_v0 = vpack.c.bf16 (!%p1703_p10), %v1378_v63, %v1377_v62  ;;  %v2165_v3 = vpack.c.bf16 (!%p1703_p10), %v1380_v2, %v1379_v1  ;;  %v1381_v4 = vld [vmem:[#allocation10 + $0xe0] sm:$0xff] (!%p1703_p10)  ;;  %v1382_v5 = vld [vmem:[#allocation10 + $0xe8] sm:$0xff] (!%p1703_p10)  ;;  %v1096_v7 = vld [vmem:[#allocation3 + $0x10] sm:$0xff] (!%p1703_p10) }
 0x3d0   : > { %2148 = vmatpush3.bf16.msra.mxu1 %v2145_v53  ;;  %v2169_v6 = vpack.c.bf16 %v1382_v5, %v1381_v4  ;;  %v1094_v8 = vld [vmem:[#allocation3] sm:$0xff]  ;;  %v1097_v13 = vld [vmem:[#allocation3 + $0x18] sm:$0xff]  ;;  %v1095_v14 = vld [vmem:[#allocation3 + $0x8] sm:$0xff] }
 0x3d1   : > { %2150 = vmatprep.subr.bf16.mxu1 %v2149_v55  ;;  %v1099_v19 = vld [vmem:[#allocation3 + $0x28] sm:$0xff]  ;;  %v1098_v20 = vld [vmem:[#allocation3 + $0x20] sm:$0xff]  ;;  %v1101_v27 = vld [vmem:[#allocation3 + $0x38] sm:$0xff] }
 0x3d2   : > { %1129 = vperm.xlu1 %2266, %v1091_v44   ;;  %1124 = vperm.xlu0 %2265, %v1090_v45   ;;  %v1100_v28 = vld [vmem:[#allocation3 + $0x30] sm:$0xff]  ;;  %v1754_v35 = vld [vmem:[#allocation5 + $0x8] sm:$0xff]   ;;  %v1756_v41 = vld [vmem:[#allocation5 + $0x18] sm:$0xff]  }
 0x3d3   : > { %v1741_v37 = vunpack.c.l.bf16 %v1754_v35  ;;  %v1755_v38 = vld [vmem:[#allocation5 + $0x10] sm:$0xff]  }
 0x3d4   : > { %2152 = vmatpush3.bf16.msra.mxu1 %v2149_v55 }
 0x3d5   : > { %2154 = vmatprep.subr.bf16.mxu1 %v2153_v58 }
 0x3d6   : > { %1139 = vperm.xlu1 %2266, %v1093_v46   ;;  %1134 = vperm.xlu0 %2265, %v1092_v47  }
 0x3d8   : > { %2156 = vmatpush3.bf16.msra.mxu1 %v2153_v58 }
 0x3d9   : > { %2158 = vmatprep.subr.bf16.mxu1 %v2157_v61 }
 0x3da   : > { %1328 = vperm.xlu1 %2266, %v1087_v43   ;;  %1323 = vperm.xlu0 %2265, %v1086_v40   ;;  %v1745_v40 = vunpack.c.l.bf16 %v1755_v38  ;;  %v1749_v43 = vunpack.c.l.bf16 %v1756_v41 }
 0x3dc   : > { %2160 = vmatpush3.bf16.msra.mxu1 %v2157_v61 }
 0x3dd   : > { %2162 = vmatprep.subr.bf16.mxu1 %v2161_v0 }
 0x3de   : > { %1338 = vperm.xlu1 %2266, %v1089_v42   ;;  %1333 = vperm.xlu0 %2265, %v1088_v39   ;;  %v1742_v39 = vunpack.c.h.bf16 %v1754_v35  ;;  %v1746_v42 = vunpack.c.h.bf16 %v1755_v38  ;;  %v1533_v35 = vld [vmem:[#allocation2 + $0x18] sm:$0xff] }
 0x3e0   : > { %2164 = vmatpush3.bf16.msra.mxu1 %v2161_v0 }
 0x3e1   : > { %2166 = vmatprep.subr.bf16.mxu1 %v2165_v3 }
 0x3e2   : > { %1348 = vperm.xlu1 %2266, %v1091_v44   ;;  %1343 = vperm.xlu0 %2265, %v1090_v45   ;;  %v1750_v44 = vunpack.c.h.bf16 %v1756_v41  ;;  %v1383_v45 = vld [vmem:[#allocation10 + $0xf0] sm:$0xff] }
 0x3e4   : > { %2168 = vmatpush3.bf16.msra.mxu1 %v2165_v3 }
 0x3e5   : > { %2170 = vmatprep.subr.bf16.mxu1 %v2169_v6 }
 0x3e6   : > { %1358 = vperm.xlu1 %2266, %v1093_v46   ;;  %1353 = vperm.xlu0 %2265, %v1092_v47   ;;  %v1384_v46 = vld [vmem:[#allocation10 + $0xf8] sm:$0xff] }
 0x3e7   : > { %v2173_v47 = vpack.c.bf16 %v1384_v46, %v1383_v45 }
 0x3e8   : > { %2172 = vmatpush3.bf16.msra.mxu1 %v2169_v6 }
 0x3e9   : > { %2174 = vmatprep.subr.bf16.mxu1 %v2173_v47 }
 0x3ec   : > { %2176 = vmatpush3.bf16.msra.mxu1 %v2173_v47 }
 0x449   : > { %v1115_v9 = vpop.permute.xlu1 %1114  ;;  %v1105_v10 = vpop.permute.xlu0 %1104 }
 0x44a   : > { %v1144_v11 = vmul.f32 %v1115_v9, %v1096_v7  ;;  %v1142_v12 = vmul.f32 %v1105_v10, %v1094_v8  ;;  %v1712_v8 = vld [vmem:[%s2774_s8 + $0x1] ss:$0 sm:$0xff]  ;;  %v1713_v10 = vld [vmem:[%s2771_s5 + $0x2] ss:$0 sm:$0xff] }
 0x44d   : > { %v1120_v15 = vpop.permute.xlu1 %1119  ;;  %v1110_v16 = vpop.permute.xlu0 %1109 }
 0x44e   : > { %v1145_v17 = vmul.f32 %v1120_v15, %v1097_v13  ;;  %v1143_v18 = vmul.f32 %v1110_v16, %v1095_v14  ;;  %v1714_v13 = vld [vmem:[%s2772_s6 + $0x2] ss:$0 sm:$0xff] }
 0x450   : > { %v2129_v21 = vpack.c.bf16 %v1143_v18, %v1142_v12  ;;  %v2133_v26 = vpack.c.bf16 %v1145_v17, %v1144_v11 }
 0x451   : > { %v1130_v22 = vpop.permute.xlu1 %1129  ;;  %v1125_v23 = vpop.permute.xlu0 %1124 }
 0x452   : > { %v1147_v24 = vmul.f32 %v1130_v22, %v1099_v19  ;;  %v1146_v25 = vmul.f32 %v1125_v23, %v1098_v20  ;;  %2130 = vmatprep.subr.bf16.mxu0 %v2129_v21 }
 0x453   : > { %2132 = vmatpush3.bf16.msra.mxu0 %v2129_v21  ;;  %v1531_v21 = vld [vmem:[#allocation2 + $0x8] sm:$0xff] }
 0x454   : > { %2134 = vmatprep.subr.bf16.mxu0 %v2133_v26  ;;  %v2137_v33 = vpack.c.bf16 %v1147_v24, %v1146_v25  ;;  %v1530_v25 = vld [vmem:[#allocation2] sm:$0xff] }
 0x455   : > { %v1140_v29 = vpop.permute.xlu1 %1139  ;;  %v1135_v30 = vpop.permute.xlu0 %1134 }
 0x456   : > { %v1149_v31 = vmul.f32 %v1140_v29, %v1101_v27  ;;  %v1148_v32 = vmul.f32 %v1135_v30, %v1100_v28 }
 0x457   : > { %2136 = vmatpush3.bf16.msra.mxu0 %v2133_v26 }
 0x458   : > { %2138 = vmatprep.subr.bf16.mxu0 %v2137_v33  ;;  %v2141_v34 = vpack.c.bf16 %v1149_v31, %v1148_v32 }
 0x459   : > { %v1324_v48 = vpop.permute.xlu0 %1323  ;;  %v1329_v49 = vpop.permute.xlu1 %1328 }
 0x45b   : > { %2140 = vmatpush3.bf16.msra.mxu0 %v2137_v33 }
 0x45c   : > { %2142 = vmatprep.subr.bf16.mxu0 %v2141_v34 }
 0x45d   : > { %v1334_v51 = vpop.permute.xlu0 %1333  ;;  %v1339_v53 = vpop.permute.xlu1 %1338 }
 0x45f   : > { %2144 = vmatpush3.bf16.msra.mxu0 %v2141_v34 }
 0x461   : > { %v1344_v59 = vpop.permute.xlu0 %1343  ;;  %v1349_v61 = vpop.permute.xlu1 %1348 }
 0x462   : > { %1994 = vmatmul.mubr.msk.f32.vlgmr.msra.gmra.mrb[0].mxu0 %vm1182_vm1, %v1738_v36 }
 0x463   : > { %1996 = vmatprep.mubr.msk.f32.mxu0 %vm1182_vm1, %v1741_v37 }
 0x465   : > { %v1354_v3 = vpop.permute.xlu0 %1353  ;;  %v1359_v5 = vpop.permute.xlu1 %1358 }
 0x466   : > { %1997 = vmatmul.mubr.msk.f32.gmra.mrb[2].mxu0 %vm1182_vm1, %v1742_v39  ;;  %v1532_v39 = vld [vmem:[#allocation2 + $0x10] sm:$0xff] }
 0x467   : > { %1999 = vmatprep.mubr.msk.f32.mxu0 %vm1182_vm1, %v1745_v40 }
 0x46a   : > { %2000 = vmatmul.mubr.msk.f32.gmra.mrb[4].mxu0 %vm1182_vm1, %v1746_v42 }
 0x46b   : > { %2002 = vmatprep.mubr.msk.f32.mxu0 %vm1182_vm1, %v1749_v43 }
 0x46e   : > { %2003 = vmatmul.mubr.msk.f32.gmra.mrb[6].mxu0 %vm1182_vm1, %v1750_v44 }
 0x535   : > { %v1995_v50 = vpop.f32.mrb[0].mxu0 }
 0x536   : > { %v1273_v52 = vpop.f32.mrb[1].mxu0  ;;  %v1362_v55 = vmul.f32 %v1995_v50, %v1329_v49  ;;  %v1535_v49 = vld [vmem:[#allocation2 + $0x28] sm:$0xff] }
 0x537   : > { %v1361_v54 = vmul.f32 %v1324_v48, %v1273_v52 }
 0x539   : > { %v1998_v56 = vpop.f32.mrb[2].mxu0  ;;  %2037 = vmatprep.mubr.f32.mxu1 %v1361_v54 }
 0x53a   : > { %v1283_v57 = vpop.f32.mrb[3].mxu0  ;;  %2038 = vmatmul.mubr.f32.vlgmr.msra.gmra.mrb[0].mxu1 %v1362_v55  ;;  %v1364_v60 = vmul.f32 %v1998_v56, %v1339_v53  ;;  %v1534_v53 = vld [vmem:[#allocation2 + $0x20] sm:$0xff] }
 0x53b   : > { %v1363_v58 = vmul.f32 %v1334_v51, %v1283_v57 }
 0x53d   : > { %v2001_v62 = vpop.f32.mrb[4].mxu0  ;;  %2040 = vmatprep.mubr.f32.mxu1 %v1363_v58 }
 0x53e   : > { %v1293_v63 = vpop.f32.mrb[5].mxu0  ;;  %2041 = vmatmul.mubr.f32.gmra.mrb[2].mxu1 %v1364_v60  ;;  %v1366_v1 = vmul.f32 %v2001_v62, %v1349_v61  ;;  %v1537_v60 = vld [vmem:[#allocation2 + $0x38] sm:$0xff] }
 0x53f   : > { %v1365_v0 = vmul.f32 %v1344_v59, %v1293_v63  ;;  %v1536_v63 = vld [vmem:[#allocation2 + $0x30] sm:$0xff] }
 0x541   : > { %v2004_v2 = vpop.f32.mrb[6].mxu0  ;;  %2043 = vmatprep.mubr.f32.mxu1 %v1365_v0 }
 0x542   : > { %v1303_v4 = vpop.f32.mrb[7].mxu0  ;;  %2044 = vmatmul.mubr.f32.gmra.mrb[4].mxu1 %v1366_v1  ;;  %v1368_v7 = vmul.f32 %v2004_v2, %v1359_v5 }
 0x543   : > { %v1367_v6 = vmul.f32 %v1354_v3, %v1303_v4 }
 0x545   : > { %2046 = vmatprep.mubr.f32.mxu1 %v1367_v6 }
 0x546   : > { %2047 = vmatmul.mubr.f32.gmra.mrb[6].mxu1 %v1368_v7 }
 0x60d   : > { %v2039_v9 = vpop.f32.mrb[0].mxu1 }
 0x60e   : > { %v1462_v11 = vadd.f32 %v2039_v9, %v1712_v8  ;;  %v1456_v12 = vpop.f32.mrb[1].mxu1 }
 0x60f   : > { %v1457_v14 = vadd.f32 %v1712_v8, %v1456_v12 }
 0x610   : > { %v1501_v15 = vmul.f32 %v1713_v10, %v1462_v11 }
 0x611   : > { %v1500_v16 = vmul.f32 %v1713_v10, %v1457_v14  ;;  %v2042_v17 = vpop.f32.mrb[2].mxu1 }
 0x612   : > { %v1514_v18 = vadd.f32 %v1714_v13, %v1501_v15  ;;  %v1472_v19 = vadd.f32 %v2042_v17, %v1712_v8  ;;  %v1466_v20 = vpop.f32.mrb[3].mxu1 }
 0x613   : > { %v1513_v22 = vadd.f32 %v1714_v13, %v1500_v16  ;;  %v1467_v23 = vadd.f32 %v1712_v8, %v1466_v20 }
 0x614   : > { %v1522_v24 = vmax.f32 %v1514_v18, 0.0  ;;  %v1503_v26 = vmul.f32 %v1713_v10, %v1472_v19 }
 0x615   : > { %v1521_v27 = vmax.f32 %v1513_v22, 0.0  ;;  %v1502_v28 = vmul.f32 %v1713_v10, %v1467_v23  ;;  %v2045_v29 = vpop.f32.mrb[4].mxu1 }
 0x616   : > { %v1539_v30 = vadd.f32 %v1531_v21, %v1522_v24  ;;  %v1516_v31 = vadd.f32 %v1714_v13, %v1503_v26  ;;  %v1482_v32 = vadd.f32 %v2045_v29, %v1712_v8  ;;  %v1476_v33 = vpop.f32.mrb[5].mxu1 }
 0x617   : > { %v1538_v34 = vadd.f32 %v1530_v25, %v1521_v27  ;;  %v1515_v36 = vadd.f32 %v1714_v13, %v1502_v28  ;;  %v1477_v37 = vadd.f32 %v1712_v8, %v1476_v33 }
 0x618   : > { %1548 = vst [vmem:[#allocation3 + $0x8] sm:$0xff] %v1539_v30  ;;  %1556 = vst [vmem:[#allocation11 + $0x8] sm:$0xff] %v1539_v30  ;;  %v1524_v38 = vmax.f32 %v1516_v31, 0.0  ;;  %v1505_v40 = vmul.f32 %v1713_v10, %v1482_v32 }
 0x619   : > { %1547 = vst [vmem:[#allocation3] sm:$0xff] %v1538_v34  ;;  %1555 = vst [vmem:[#allocation11] sm:$0xff] %v1538_v34  ;;  %v1523_v41 = vmax.f32 %v1515_v36, 0.0  ;;  %v1504_v42 = vmul.f32 %v1713_v10, %v1477_v37  ;;  %v2048_v43 = vpop.f32.mrb[6].mxu1 }
 0x61a   : > { %v1541_v44 = vadd.f32 %v1533_v35, %v1524_v38  ;;  %v1518_v45 = vadd.f32 %v1714_v13, %v1505_v40  ;;  %v1492_v46 = vadd.f32 %v2048_v43, %v1712_v8  ;;  %v1486_v47 = vpop.f32.mrb[7].mxu1 }
 0x61b   : > { %v1540_v48 = vadd.f32 %v1532_v39, %v1523_v41  ;;  %v1517_v50 = vadd.f32 %v1714_v13, %v1504_v42  ;;  %v1487_v51 = vadd.f32 %v1712_v8, %v1486_v47 }
 0x61c   : > { %1550 = vst [vmem:[#allocation3 + $0x18] sm:$0xff] %v1541_v44  ;;  %1558 = vst [vmem:[#allocation11 + $0x18] sm:$0xff] %v1541_v44  ;;  %v1526_v52 = vmax.f32 %v1518_v45, 0.0  ;;  %v1507_v54 = vmul.f32 %v1713_v10, %v1492_v46 }
 0x61d   : > { %1549 = vst [vmem:[#allocation3 + $0x10] sm:$0xff] %v1540_v48  ;;  %1557 = vst [vmem:[#allocation11 + $0x10] sm:$0xff] %v1540_v48  ;;  %v1525_v55 = vmax.f32 %v1517_v50, 0.0  ;;  %v1506_v56 = vmul.f32 %v1713_v10, %v1487_v51 }
 0x61e   : > { %v1543_v57 = vadd.f32 %v1535_v49, %v1526_v52  ;;  %v1520_v58 = vadd.f32 %v1714_v13, %v1507_v54 }
 0x61f   : > { %v1542_v59 = vadd.f32 %v1534_v53, %v1525_v55  ;;  %v1519_v61 = vadd.f32 %v1714_v13, %v1506_v56 }
 0x620   : > { %1552 = vst [vmem:[#allocation3 + $0x28] sm:$0xff] %v1543_v57  ;;  %1560 = vst [vmem:[#allocation11 + $0x28] sm:$0xff] %v1543_v57  ;;  %v1528_v62 = vmax.f32 %v1520_v58, 0.0 }
 0x621   : > { %1551 = vst [vmem:[#allocation3 + $0x20] sm:$0xff] %v1542_v59  ;;  %1559 = vst [vmem:[#allocation11 + $0x20] sm:$0xff] %v1542_v59  ;;  %v1527_v0 = vmax.f32 %v1519_v61, 0.0 }
 0x622   : > { %v1545_v1 = vadd.f32 %v1537_v60, %v1528_v62 }
 0x623   : > { %v1544_v2 = vadd.f32 %v1536_v63, %v1527_v0 }
 0x624   : > { %1554 = vst [vmem:[#allocation3 + $0x38] sm:$0xff] %v1545_v1  ;;  %1562 = vst [vmem:[#allocation11 + $0x38] sm:$0xff] %v1545_v1 }
 0x625   : > { %1553 = vst [vmem:[#allocation3 + $0x30] sm:$0xff] %v1544_v2  ;;  %1561 = vst [vmem:[#allocation11 + $0x30] sm:$0xff] %v1544_v2 }
 0x626 PF: > { %s2793_s12 = sadd.s32 4294967295, %s2411_s11   ;;  %s2422_s21 = smov [#allocation11]  }
 0x627   : > { %p2731_p11 = scmp.eq.s32.totalorder %s2793_s12, 2  ;;  %s1572_s19 = sshll.u32 %s2422_s21, 4  ;;  %s1573_s19 = int_to_ptr.vmem [resolvable:$true] %s1572_s19 }
 0x628   : > { %s2351_s30 = scalar_lea.vmem %s1573_s19, 1024  ;;  %p2358_p0 = scmp.lt.s32.totalorder %s1573_s19, %s1573_s19 }
 0x629   : > { %p2352_p12 = scmp.ne.s32.totalorder %s1573_s19, %s2351_s30  ;;  %p2359_p1 = scmp.lt.s32.totalorder %s2351_s30, %s2351_s30 }
 0x62b   : > { %p2353_p13 = pnand %p2352_p12, %p2731_p11  ;;  %p2360_p4 = por %p2359_p1, %p2358_p0 }
 0x62d   : > { %p2354_p6 = pneg %p2353_p13 }
 0x62f   : > { %p2361_p7 = pnand %p2360_p4, %p2354_p6 }
 0x631   : > { %2364 = shalt.err (!%p2361_p7)
}
 0x632   : > { %s2365_s22 = scalar_lea.hbm %s2775_s9, 1024 }
 0x633   : > { %p2366_p9 = scmp.ne.s32.totalorder %s2775_s9, %s2365_s22  ;;  %p2371_p2 = scmp.lt.u32.totalorder %s2365_s22, %s2775_s9 }
 0x635   : > { %p2367_p3 = pnand %p2366_p9, %p2731_p11 }
 0x637   : > { %p2368_p8 = pneg %p2367_p3 }
 0x639   : > { %p2373_p5 = pnand %p2371_p2, %p2368_p8 }
 0x63b   : > { %2376 = shalt.err (!%p2373_p5)
}
 0x63c   : > { %s2423_s10 = smov 128   ;;  %s2424_s14 = smov 8  }
 0x63d   : > { %2206 = dma.vmem_to_hbm [thread:$0]  (%p2731_p11), %s1573_s19, 1024, %s2775_s9, [#allocation7], %s2423_s10, %s2423_s10, %s2424_s14  }
 0x63e   : > { %2398 = dma.done.wait (%p2731_p11), [#allocation7], 1024  }
 0x63f   : > { %2400 = vsyncadd (%p2731_p11), [#allocation7], 4294966272 }
 0x640 PF: > { %s22_s11 = sadd.s32 1, %s2411_s11   ;;  %s2795_s30 = sld [smem:[#allocation15_spill]] }
 0x641   : > { %p19_p10 = scmp.ge.s32.totalorder %s22_s11, 5   ;;  %s2796_s10 = smov %s2798_s18 }
 0x643   :  { %21 = sbr.rel (!%p19_p10) target bundleno = 4 (0x4), region = 126 }
 0x64a   :  { %1588 = vsyncpa [#allocation6], 1 }
 0x64b   :  { %1590 = vsyncpa [#allocation6 + $0x1], 1 }
 0x64c   :  { %1591 = vsyncpa [#allocation9], 1 }
 0x64d   :  { %1592 = vsyncpa [#allocation7], 1 }
 0x64e   :  { %1594 = vsyncpa [#allocation7 + $0x1], 1 }

</bundles_post_ra>
